<compile_context>
chip_gen: v5e
topology: v5e:2x2
jax: 0.10.0
libtpu: 0.0.40
codegen_flags: <defaults>
</compile_context>

<pallas_src>
import functools

import jax
import jax.numpy as jnp
import numpy as np
from jax import lax
from jax.experimental import pallas as pl
from jax.experimental.pallas import tpu as pltpu


def _round_up(v, m):
    return -(-v // m) * m


def _build_masks(H, W):
    """Precomputed 0/1 boundary masks for every tap offset used (dilations 1, 3, 5)."""
    HW = H * W
    rr = np.repeat(np.arange(H), W)
    cc = np.tile(np.arange(W), H)
    idx, rows = {}, []
    for d in (1, 3, 5):
        for di in (-d, 0, d):
            for dj in (-d, 0, d):
                if (di, dj) == (0, 0) or (di, dj) in idx:
                    continue
                valid = ((rr + di >= 0) & (rr + di < H) &
                         (cc + dj >= 0) & (cc + dj < W))
                idx[(di, dj)] = len(rows)
                rows.append(valid.astype(np.float32))
    return np.stack(rows), idx


def _rfb_kernel(x_ref, w1_ref,
                w_b1c2, w_b2c2, w_b2c3, w_b3c2, w_b3c3,
                w_b4c2, w_b4c3, w_b4c4,
                w_lin, bias_ref, mask_ref, o_ref,
                *, H, W, cout, bcp, b4ap, b_off, mask_idx, mxu_dtype):
    """One batch element per grid step.

    x_ref   : (1, Cin, HW)  lane-dense input (flattened NCHW)
    w1_ref  : (Cout+3*bcp+b4ap, Cin)   fused shortcut/branch-entry 1x1 weights
    w_*     : (co_pad, kh*kw*ci_pad)   tap-major flattened spatial-conv weights
    w_lin   : (Cout, 4*bcp)            conv_linear weights (per-branch zero-padded cols)
    bias_ref: (sum_co, 1) f32          all biases packed, sliced at static offsets
    mask_ref: (n_offsets, HW) f32      0/1 boundary masks per spatial tap offset
    o_ref   : (1, Cout, HW)            lane-dense output (flattened NCHW)
    """
    HW = H * W
    f32 = jnp.float32

    def lrelu(v):
        return jnp.where(v >= 0.0, v, v * 0.2)

    ball = bias_ref[...]                                   # (sum_co, 1) f32

    def shifted(v, di, dj):
        # v[:, p] -> v[:, p + di*W + dj] with out-of-image positions zeroed.
        s = di * W + dj
        xs = v if s == 0 else pltpu.roll(v, (-s) % HW, axis=1)
        if di == 0 and dj == 0:
            return xs
        return xs * mask_ref[pl.ds(mask_idx[(di, dj)], 1), :]

    def conv_sp(v, w_ref, b_idx, kh, kw, dil):
        # 'same' conv, stride 1, dilation `dil`: tap-stacked im2col along K, one MXU dot.
        ph = dil * (kh - 1) // 2
        pw = dil * (kw - 1) // 2
        taps = [shifted(v, i * dil - ph, j * dil - pw)
                for i in range(kh) for j in range(kw)]
        stk = jnp.concatenate(taps, axis=0)                # (kh*kw*ci, HW) f32
        w = w_ref[...]                                     # (co, kh*kw*ci) mxu_dtype
        y = jnp.dot(w, stk.astype(mxu_dtype), preferred_element_type=f32)
        return y + ball[b_off[b_idx]:b_off[b_idx] + w.shape[0]]

    # ---- fused shortcut + four branch-entry 1x1 convs: one MXU dot over x ------------
    x = x_ref[0].astype(mxu_dtype)                         # (Cin, HW)
    w1 = w1_ref[...]
    y1 = jnp.dot(w1, x, preferred_element_type=f32) + ball[:w1.shape[0]]

    o = 0
    sc = y1[o:o + cout] * 0.2;   o += cout                 # shortcut, pre-scaled by 0.2
    b1 = lrelu(y1[o:o + bcp]);   o += bcp
    b2 = lrelu(y1[o:o + bcp]);   o += bcp
    b3 = lrelu(y1[o:o + bcp]);   o += bcp
    b4 = lrelu(y1[o:o + b4ap])

    # ---- branches ---------------------------------------------------------------------
    b1 = conv_sp(b1, w_b1c2, 1, 3, 3, 1)                   # 3x3 dil 1
    b2 = lrelu(conv_sp(b2, w_b2c2, 2, 1, 3, 1))            # (1,3)
    b2 = conv_sp(b2, w_b2c3, 3, 3, 3, 3)                   # 3x3 dil 3
    b3 = lrelu(conv_sp(b3, w_b3c2, 4, 3, 1, 1))            # (3,1)
    b3 = conv_sp(b3, w_b3c3, 5, 3, 3, 3)                   # 3x3 dil 3
    b4 = lrelu(conv_sp(b4, w_b4c2, 6, 1, 3, 1))            # (1,3)
    b4 = lrelu(conv_sp(b4, w_b4c3, 7, 3, 1, 1))            # (3,1)
    b4 = conv_sp(b4, w_b4c4, 8, 3, 3, 5)                   # 3x3 dil 5

    # ---- conv_linear over the sublane-axis branch concat + residual --------------------
    cat = jnp.concatenate([b1, b2, b3, b4], axis=0).astype(mxu_dtype)   # (4*bcp, HW)
    out = jnp.dot(w_lin[...], cat, preferred_element_type=f32)
    out = out + ball[b_off[9]:b_off[9] + cout] + sc
    o_ref[0] = out.astype(o_ref.dtype)                     # lane-dense (Cout, HW) store


def receptive_field_block(x_nchw, params, *, mxu_dtype=jnp.bfloat16):
    """Matches ReceptiveFieldBlock.forward (NCHW in/out like PyTorch)."""
    N, Cin, H, W = x_nchw.shape
    Cout = int(params["shortcut_w"].shape[-1])
    HW = H * W
    bc = Cin // 4
    bcp = _round_up(bc, 8)
    b4ap = _round_up(max(bc // 2, 1), 8)
    b4bp = _round_up(max(bc // 4 * 3, 1), 8)

    def mat1x1(name, co_pad):
        w = params[name + "_w"]                            # (1,1,ci,co) HWIO
        ci, co = int(w.shape[2]), int(w.shape[3])
        m = jnp.transpose(w.reshape(ci, co))               # (co, ci)
        return jnp.pad(m, ((0, co_pad - co), (0, 0)))

    def matsp(name, ci_pad, co_pad):
        w = params[name + "_w"]                            # (kh,kw,ci,co) HWIO
        kh, kw, ci, co = (int(s) for s in w.shape)
        m = jnp.pad(w, ((0, 0), (0, 0), (0, ci_pad - ci), (0, co_pad - co)))
        m = m.reshape(kh * kw, ci_pad, co_pad)
        return jnp.transpose(m, (2, 0, 1)).reshape(co_pad, kh * kw * ci_pad)

    def bvec(name, co_pad):
        v = params[name + "_b"]
        return jnp.pad(v, ((0, co_pad - int(v.shape[0])),))

    # Fused x-side 1x1 weights (rows: shortcut | b1c1 | b2c1 | b3c1 | b4c1).
    w1 = jnp.concatenate([mat1x1("shortcut", Cout),
                          mat1x1("b1c1", bcp), mat1x1("b2c1", bcp),
                          mat1x1("b3c1", bcp), mat1x1("b4c1", b4ap)], axis=0)

    sp_defs = (("b1c2", bcp, bcp), ("b2c2", bcp, bcp), ("b2c3", bcp, bcp),
               ("b3c2", bcp, bcp), ("b3c3", bcp, bcp),
               ("b4c2", b4ap, b4bp), ("b4c3", b4bp, bcp), ("b4c4", bcp, bcp))
    w_sp = [matsp(n, ci, co) for n, ci, co in sp_defs]

    # conv_linear: (Cout, 4*bc) with zero columns inserted so each branch spans bcp.
    wl = jnp.transpose(params["linear_w"].reshape(4 * bc, Cout)).reshape(Cout, 4, bc)
    wl = jnp.pad(wl, ((0, 0), (0, 0), (0, bcp - bc))).reshape(Cout, 4 * bcp)

    # One packed f32 bias vector; the kernel slices it at static offsets.
    bias_chunks = [bvec("shortcut", Cout), bvec("b1c1", bcp), bvec("b2c1", bcp),
                   bvec("b3c1", bcp), bvec("b4c1", b4ap),
                   bvec("b1c2", bcp), bvec("b2c2", bcp), bvec("b2c3", bcp),
                   bvec("b3c2", bcp), bvec("b3c3", bcp),
                   bvec("b4c2", b4bp), bvec("b4c3", bcp), bvec("b4c4", bcp),
                   bvec("linear", Cout)]
    co1 = Cout + 3 * bcp + b4ap
    b_off, cur = [0], co1
    for c in (bcp, bcp, bcp, bcp, bcp, b4bp, bcp, bcp):    # b1c2..b4c4
        b_off.append(cur)
        cur += c
    b_off.append(cur)                                      # linear
    bias_all = jnp.concatenate(bias_chunks).astype(jnp.float32).reshape(-1, 1)

    masks_np, mask_idx = _build_masks(H, W)
    masks = jnp.asarray(masks_np)

    # NCHW -> (N, Cin, H*W): pure reshape (no XLA transpose); this IS the kernel layout.
    args = ([x_nchw.reshape(N, Cin, HW), w1.astype(mxu_dtype)]
            + [w.astype(mxu_dtype) for w in w_sp]
            + [wl.astype(mxu_dtype), bias_all, masks])

    def _const_spec(a):
        zeros = (0,) * a.ndim
        return pl.BlockSpec(a.shape, lambda n, _z=zeros: _z)

    in_specs = [pl.BlockSpec((1, Cin, HW), lambda n: (n, 0, 0))]
    in_specs += [_const_spec(a) for a in args[1:]]

    kernel = functools.partial(
        _rfb_kernel, H=H, W=W, cout=Cout, bcp=bcp, b4ap=b4ap,
        b_off=tuple(b_off), mask_idx=mask_idx, mxu_dtype=mxu_dtype)

    out = pl.pallas_call(
        kernel,
        out_shape=jax.ShapeDtypeStruct((N, Cout, HW), x_nchw.dtype),
        grid_spec=pltpu.PrefetchScalarGridSpec(
            num_scalar_prefetch=0,
            grid=(N,),
            in_specs=in_specs,
            out_specs=pl.BlockSpec((1, Cout, HW), lambda n: (n, 0, 0)),
        ),
        compiler_params=pltpu.CompilerParams(
            dimension_semantics=("parallel",)),
    )(*args)
    return out.reshape(N, Cout, H, W)                      # (N, Cout, H*W) is NCHW flat


def init_params(key, in_channels, out_channels):
    """Deterministic synthetic parameters (weights in HWIO layout).

    in_channels must be >= 16 so branch4's (bc//2, bc//4*3) channel counts are non-zero.
    """
    bc = in_channels // 4
    dims = {
        "shortcut": (1, 1, in_channels, out_channels),
        "b1c1": (1, 1, in_channels, bc), "b1c2": (3, 3, bc, bc),
        "b2c1": (1, 1, in_channels, bc), "b2c2": (1, 3, bc, bc), "b2c3": (3, 3, bc, bc),
        "b3c1": (1, 1, in_channels, bc), "b3c2": (3, 1, bc, bc), "b3c3": (3, 3, bc, bc),
        "b4c1": (1, 1, in_channels, bc // 2),
        "b4c2": (1, 3, bc // 2, bc // 4 * 3),
        "b4c3": (3, 1, bc // 4 * 3, bc),
        "b4c4": (3, 3, bc, bc),
        "linear": (1, 1, 4 * bc, out_channels),
    }
    params = {}
    for name, (kh, kw, ci, co) in dims.items():
        key, kw_key, kb_key = jax.random.split(key, 3)
        bound = 1.0 / np.sqrt(kh * kw * ci)
        params[name + "_w"] = jax.random.uniform(
            kw_key, (kh, kw, ci, co), jnp.float32, -bound, bound)
        params[name + "_b"] = jax.random.uniform(
            kb_key, (co,), jnp.float32, -bound, bound)
    return params


# ----------------------------- pure-JAX reference -----------------------------
def _conv_ref(x_nhwc, w_hwio, b, dh=1, dw=1):
    kh, kw = int(w_hwio.shape[0]), int(w_hwio.shape[1])
    ph = dh * (kh - 1) // 2
    pw = dw * (kw - 1) // 2
    y = lax.conv_general_dilated(
        x_nhwc, w_hwio, window_strides=(1, 1),
        padding=((ph, ph), (pw, pw)), rhs_dilation=(dh, dw),
        dimension_numbers=("NHWC", "HWIO", "NHWC"))
    return y + b.reshape(1, 1, 1, -1)


def receptive_field_block_ref(x_nchw, params):
    lrelu = lambda v: jnp.where(v >= 0, v, v * 0.2)
    p = params
    x = jnp.transpose(x_nchw, (0, 2, 3, 1))
    sc = _conv_ref(x, p["shortcut_w"], p["shortcut_b"]) * 0.2
    b1 = lrelu(_conv_ref(x, p["b1c1_w"], p["b1c1_b"]))
    b1 = _conv_ref(b1, p["b1c2_w"], p["b1c2_b"])
    b2 = lrelu(_conv_ref(x, p["b2c1_w"], p["b2c1_b"]))
    b2 = lrelu(_conv_ref(b2, p["b2c2_w"], p["b2c2_b"]))
    b2 = _conv_ref(b2, p["b2c3_w"], p["b2c3_b"], 3, 3)
    b3 = lrelu(_conv_ref(x, p["b3c1_w"], p["b3c1_b"]))
    b3 = lrelu(_conv_ref(b3, p["b3c2_w"], p["b3c2_b"]))
    b3 = _conv_ref(b3, p["b3c3_w"], p["b3c3_b"], 3, 3)
    b4 = lrelu(_conv_ref(x, p["b4c1_w"], p["b4c1_b"]))
    b4 = lrelu(_conv_ref(b4, p["b4c2_w"], p["b4c2_b"]))
    b4 = lrelu(_conv_ref(b4, p["b4c3_w"], p["b4c3_b"]))
    b4 = _conv_ref(b4, p["b4c4_w"], p["b4c4_b"], 5, 5)
    cat = jnp.concatenate([b1, b2, b3, b4], axis=-1)
    out = _conv_ref(cat, p["linear_w"], p["linear_b"]) + sc
    return jnp.transpose(out, (0, 3, 1, 2))


if __name__ == "__main__":
    # in_channels must be >= 16 (branch4 uses bc//2 and bc//4*3 channels); keep it small.
    N, C, H, W = 2, 16, 16, 16
    out_channels = 16

    key = jax.random.PRNGKey(0)
    key, kx = jax.random.split(key)
    x = jax.random.normal(kx, (N, C, H, W), jnp.float32)
    params = init_params(key, C, out_channels)

    out = jax.jit(receptive_field_block)(x, params)
    out = jax.block_until_ready(out)

    ref = receptive_field_block_ref(x, params)
    assert out.shape == (N, out_channels, H, W)
    # bf16 MXU operands (f32 accumulation): tolerance loosened accordingly.
    np.testing.assert_allclose(np.asarray(out), np.asarray(ref), rtol=5e-2, atol=5e-2)

    print("KERNEL_OK")
</pallas_src>

<mosaic_0001>
module attributes {stable_mosaic.version = 11 : i64} {
  func.func @_rfb_kernel(%arg0: i32, %arg1: memref<1x16x256xf32, #tpu.memory_space<vmem>>, %arg2: memref<48x16xbf16, #tpu.memory_space<vmem>>, %arg3: memref<8x72xbf16, #tpu.memory_space<vmem>>, %arg4: memref<8x24xbf16, #tpu.memory_space<vmem>>, %arg5: memref<8x72xbf16, #tpu.memory_space<vmem>>, %arg6: memref<8x24xbf16, #tpu.memory_space<vmem>>, %arg7: memref<8x72xbf16, #tpu.memory_space<vmem>>, %arg8: memref<8x24xbf16, #tpu.memory_space<vmem>>, %arg9: memref<8x24xbf16, #tpu.memory_space<vmem>>, %arg10: memref<8x72xbf16, #tpu.memory_space<vmem>>, %arg11: memref<16x32xbf16, #tpu.memory_space<vmem>>, %arg12: memref<128x1xf32, #tpu.memory_space<vmem>>, %arg13: memref<24x256xf32, #tpu.memory_space<vmem>>, %arg14: memref<1x16x256xf32, #tpu.memory_space<vmem>>) attributes {dimension_semantics = [#tpu.dimension_semantics<parallel>], iteration_bounds = array<i64: 2>, scalar_prefetch = 0 : i64, scratch_operands = 0 : i64, tpu.core_type = #tpu.core_type<tc>, window_params = [{transform_indices = @transform_0, window_bounds = array<i64: 1, 16, 256>}, {pipeline_mode = #tpu.pipeline_mode<synchronous>, transform_indices = @transform_1, window_bounds = array<i64: 48, 16>}, {pipeline_mode = #tpu.pipeline_mode<synchronous>, transform_indices = @transform_2, window_bounds = array<i64: 8, 72>}, {pipeline_mode = #tpu.pipeline_mode<synchronous>, transform_indices = @transform_3, window_bounds = array<i64: 8, 24>}, {pipeline_mode = #tpu.pipeline_mode<synchronous>, transform_indices = @transform_4, window_bounds = array<i64: 8, 72>}, {pipeline_mode = #tpu.pipeline_mode<synchronous>, transform_indices = @transform_5, window_bounds = array<i64: 8, 24>}, {pipeline_mode = #tpu.pipeline_mode<synchronous>, transform_indices = @transform_6, window_bounds = array<i64: 8, 72>}, {pipeline_mode = #tpu.pipeline_mode<synchronous>, transform_indices = @transform_7, window_bounds = array<i64: 8, 24>}, {pipeline_mode = #tpu.pipeline_mode<synchronous>, transform_indices = @transform_8, window_bounds = array<i64: 8, 24>}, {pipeline_mode = #tpu.pipeline_mode<synchronous>, transform_indices = @transform_9, window_bounds = array<i64: 8, 72>}, {pipeline_mode = #tpu.pipeline_mode<synchronous>, transform_indices = @transform_10, window_bounds = array<i64: 16, 32>}, {pipeline_mode = #tpu.pipeline_mode<synchronous>, transform_indices = @transform_11, window_bounds = array<i64: 128, 1>}, {pipeline_mode = #tpu.pipeline_mode<synchronous>, transform_indices = @transform_12, window_bounds = array<i64: 24, 256>}, {transform_indices = @transform_13, window_bounds = array<i64: 1, 16, 256>}]} {
    %c0 = arith.constant 0 : index
    %c0_0 = arith.constant 0 : index
    %0 = vector.load %arg12[%c0, %c0_0] : memref<128x1xf32, #tpu.memory_space<vmem>>, vector<128x1xf32>
    %c0_1 = arith.constant 0 : index
    %c0_2 = arith.constant 0 : index
    %c0_3 = arith.constant 0 : index
    %1 = vector.load %arg1[%c0_1, %c0_2, %c0_3] : memref<1x16x256xf32, #tpu.memory_space<vmem>>, vector<1x16x256xf32>
    %2 = vector.shape_cast %1 : vector<1x16x256xf32> to vector<16x256xf32>
    %3 = arith.truncf %2 : vector<16x256xf32> to vector<16x256xbf16>
    %c0_4 = arith.constant 0 : index
    %c0_5 = arith.constant 0 : index
    %4 = vector.load %arg2[%c0_4, %c0_5] : memref<48x16xbf16, #tpu.memory_space<vmem>>, vector<48x16xbf16>
    %cst = arith.constant dense<0.000000e+00> : vector<48x256xf32>
    %5 = tpu.matmul %4, %3, %cst {dimension_numbers = #tpu.dot_dimension_numbers<[1], [0], [0], [1], [0, 0, 1, 1], [], []>} : vector<48x16xbf16>, vector<16x256xbf16>, vector<48x256xf32> -> vector<48x256xf32>
    %6 = vector.extract_strided_slice %0 {offsets = [0, 0], sizes = [48, 1], strides = [1, 1]} : vector<128x1xf32> to vector<48x1xf32>
    %7 = vector.broadcast %6 : vector<48x1xf32> to vector<48x256xf32>
    %8 = arith.addf %5, %7 : vector<48x256xf32>
    %9 = vector.extract_strided_slice %8 {offsets = [0, 0], sizes = [16, 256], strides = [1, 1]} : vector<48x256xf32> to vector<16x256xf32>
    %cst_6 = arith.constant 2.000000e-01 : f32
    %10 = vector.broadcast %cst_6 : f32 to vector<16x256xf32>
    %11 = arith.mulf %9, %10 : vector<16x256xf32>
    %12 = vector.extract_strided_slice %8 {offsets = [16, 0], sizes = [8, 256], strides = [1, 1]} : vector<48x256xf32> to vector<8x256xf32>
    %cst_7 = arith.constant 0.000000e+00 : f32
    %13 = vector.broadcast %cst_7 : f32 to vector<8x256xf32>
    %14 = arith.cmpf oge, %12, %13 : vector<8x256xf32>
    %cst_8 = arith.constant 2.000000e-01 : f32
    %15 = vector.broadcast %cst_8 : f32 to vector<8x256xf32>
    %16 = arith.mulf %12, %15 : vector<8x256xf32>
    %17 = arith.select %14, %12, %16 : vector<8x256xi1>, vector<8x256xf32>
    %18 = vector.extract_strided_slice %8 {offsets = [24, 0], sizes = [8, 256], strides = [1, 1]} : vector<48x256xf32> to vector<8x256xf32>
    %cst_9 = arith.constant 0.000000e+00 : f32
    %19 = vector.broadcast %cst_9 : f32 to vector<8x256xf32>
    %20 = arith.cmpf oge, %18, %19 : vector<8x256xf32>
    %cst_10 = arith.constant 2.000000e-01 : f32
    %21 = vector.broadcast %cst_10 : f32 to vector<8x256xf32>
    %22 = arith.mulf %18, %21 : vector<8x256xf32>
    %23 = arith.select %20, %18, %22 : vector<8x256xi1>, vector<8x256xf32>
    %24 = vector.extract_strided_slice %8 {offsets = [32, 0], sizes = [8, 256], strides = [1, 1]} : vector<48x256xf32> to vector<8x256xf32>
    %cst_11 = arith.constant 0.000000e+00 : f32
    %25 = vector.broadcast %cst_11 : f32 to vector<8x256xf32>
    %26 = arith.cmpf oge, %24, %25 : vector<8x256xf32>
    %cst_12 = arith.constant 2.000000e-01 : f32
    %27 = vector.broadcast %cst_12 : f32 to vector<8x256xf32>
    %28 = arith.mulf %24, %27 : vector<8x256xf32>
    %29 = arith.select %26, %24, %28 : vector<8x256xi1>, vector<8x256xf32>
    %30 = vector.extract_strided_slice %8 {offsets = [40, 0], sizes = [8, 256], strides = [1, 1]} : vector<48x256xf32> to vector<8x256xf32>
    %cst_13 = arith.constant 0.000000e+00 : f32
    %31 = vector.broadcast %cst_13 : f32 to vector<8x256xf32>
    %32 = arith.cmpf oge, %30, %31 : vector<8x256xf32>
    %cst_14 = arith.constant 2.000000e-01 : f32
    %33 = vector.broadcast %cst_14 : f32 to vector<8x256xf32>
    %34 = arith.mulf %30, %33 : vector<8x256xf32>
    %35 = arith.select %32, %30, %34 : vector<8x256xi1>, vector<8x256xf32>
    %c17_i32 = arith.constant 17 : i32
    %36 = tpu.dynamic_rotate %17 by %c17_i32 dim 1 : vector<8x256xf32>, i32 -> vector<8x256xf32>
    %c0_15 = arith.constant 0 : index
    %c0_16 = arith.constant 0 : index
    %37 = vector.load %arg13[%c0_15, %c0_16] : memref<24x256xf32, #tpu.memory_space<vmem>>, vector<1x256xf32>
    %38 = vector.broadcast %37 : vector<1x256xf32> to vector<8x256xf32>
    %39 = arith.mulf %36, %38 : vector<8x256xf32>
    %c16_i32 = arith.constant 16 : i32
    %40 = tpu.dynamic_rotate %17 by %c16_i32 dim 1 : vector<8x256xf32>, i32 -> vector<8x256xf32>
    %c1 = arith.constant 1 : index
    %c0_17 = arith.constant 0 : index
    %41 = vector.load %arg13[%c1, %c0_17] : memref<24x256xf32, #tpu.memory_space<vmem>>, vector<1x256xf32>
    %42 = vector.broadcast %41 : vector<1x256xf32> to vector<8x256xf32>
    %43 = arith.mulf %40, %42 : vector<8x256xf32>
    %c15_i32 = arith.constant 15 : i32
    %44 = tpu.dynamic_rotate %17 by %c15_i32 dim 1 : vector<8x256xf32>, i32 -> vector<8x256xf32>
    %c2 = arith.constant 2 : index
    %c0_18 = arith.constant 0 : index
    %45 = vector.load %arg13[%c2, %c0_18] : memref<24x256xf32, #tpu.memory_space<vmem>>, vector<1x256xf32>
    %46 = vector.broadcast %45 : vector<1x256xf32> to vector<8x256xf32>
    %47 = arith.mulf %44, %46 : vector<8x256xf32>
    %c1_i32 = arith.constant 1 : i32
    %48 = tpu.dynamic_rotate %17 by %c1_i32 dim 1 : vector<8x256xf32>, i32 -> vector<8x256xf32>
    %c3 = arith.constant 3 : index
    %c0_19 = arith.constant 0 : index
    %49 = vector.load %arg13[%c3, %c0_19] : memref<24x256xf32, #tpu.memory_space<vmem>>, vector<1x256xf32>
    %50 = vector.broadcast %49 : vector<1x256xf32> to vector<8x256xf32>
    %51 = arith.mulf %48, %50 : vector<8x256xf32>
    %c255_i32 = arith.constant 255 : i32
    %52 = tpu.dynamic_rotate %17 by %c255_i32 dim 1 : vector<8x256xf32>, i32 -> vector<8x256xf32>
    %c4 = arith.constant 4 : index
    %c0_20 = arith.constant 0 : index
    %53 = vector.load %arg13[%c4, %c0_20] : memref<24x256xf32, #tpu.memory_space<vmem>>, vector<1x256xf32>
    %54 = vector.broadcast %53 : vector<1x256xf32> to vector<8x256xf32>
    %55 = arith.mulf %52, %54 : vector<8x256xf32>
    %c241_i32 = arith.constant 241 : i32
    %56 = tpu.dynamic_rotate %17 by %c241_i32 dim 1 : vector<8x256xf32>, i32 -> vector<8x256xf32>
    %c5 = arith.constant 5 : index
    %c0_21 = arith.constant 0 : index
    %57 = vector.load %arg13[%c5, %c0_21] : memref<24x256xf32, #tpu.memory_space<vmem>>, vector<1x256xf32>
    %58 = vector.broadcast %57 : vector<1x256xf32> to vector<8x256xf32>
    %59 = arith.mulf %56, %58 : vector<8x256xf32>
    %c240_i32 = arith.constant 240 : i32
    %60 = tpu.dynamic_rotate %17 by %c240_i32 dim 1 : vector<8x256xf32>, i32 -> vector<8x256xf32>
    %c6 = arith.constant 6 : index
    %c0_22 = arith.constant 0 : index
    %61 = vector.load %arg13[%c6, %c0_22] : memref<24x256xf32, #tpu.memory_space<vmem>>, vector<1x256xf32>
    %62 = vector.broadcast %61 : vector<1x256xf32> to vector<8x256xf32>
    %63 = arith.mulf %60, %62 : vector<8x256xf32>
    %c239_i32 = arith.constant 239 : i32
    %64 = tpu.dynamic_rotate %17 by %c239_i32 dim 1 : vector<8x256xf32>, i32 -> vector<8x256xf32>
    %c7 = arith.constant 7 : index
    %c0_23 = arith.constant 0 : index
    %65 = vector.load %arg13[%c7, %c0_23] : memref<24x256xf32, #tpu.memory_space<vmem>>, vector<1x256xf32>
    %66 = vector.broadcast %65 : vector<1x256xf32> to vector<8x256xf32>
    %67 = arith.mulf %64, %66 : vector<8x256xf32>
    %68 = tpu.concatenate %39, %43, %47, %51, %17, %55, %59, %63, %67 in 0 : vector<8x256xf32>, vector<8x256xf32>, vector<8x256xf32>, vector<8x256xf32>, vector<8x256xf32>, vector<8x256xf32>, vector<8x256xf32>, vector<8x256xf32>, vector<8x256xf32> -> vector<72x256xf32>
    %c0_24 = arith.constant 0 : index
    %c0_25 = arith.constant 0 : index
    %69 = vector.load %arg3[%c0_24, %c0_25] : memref<8x72xbf16, #tpu.memory_space<vmem>>, vector<8x72xbf16>
    %70 = arith.truncf %68 : vector<72x256xf32> to vector<72x256xbf16>
    %cst_26 = arith.constant dense<0.000000e+00> : vector<8x256xf32>
    %71 = tpu.matmul %69, %70, %cst_26 {dimension_numbers = #tpu.dot_dimension_numbers<[1], [0], [0], [1], [0, 0, 1, 1], [], []>} : vector<8x72xbf16>, vector<72x256xbf16>, vector<8x256xf32> -> vector<8x256xf32>
    %72 = vector.extract_strided_slice %0 {offsets = [48, 0], sizes = [8, 1], strides = [1, 1]} : vector<128x1xf32> to vector<8x1xf32>
    %73 = vector.broadcast %72 : vector<8x1xf32> to vector<8x256xf32>
    %74 = arith.addf %71, %73 : vector<8x256xf32>
    %c1_i32_27 = arith.constant 1 : i32
    %75 = tpu.dynamic_rotate %23 by %c1_i32_27 dim 1 : vector<8x256xf32>, i32 -> vector<8x256xf32>
    %c3_28 = arith.constant 3 : index
    %c0_29 = arith.constant 0 : index
    %76 = vector.load %arg13[%c3_28, %c0_29] : memref<24x256xf32, #tpu.memory_space<vmem>>, vector<1x256xf32>
    %77 = vector.broadcast %76 : vector<1x256xf32> to vector<8x256xf32>
    %78 = arith.mulf %75, %77 : vector<8x256xf32>
    %c255_i32_30 = arith.constant 255 : i32
    %79 = tpu.dynamic_rotate %23 by %c255_i32_30 dim 1 : vector<8x256xf32>, i32 -> vector<8x256xf32>
    %c4_31 = arith.constant 4 : index
    %c0_32 = arith.constant 0 : index
    %80 = vector.load %arg13[%c4_31, %c0_32] : memref<24x256xf32, #tpu.memory_space<vmem>>, vector<1x256xf32>
    %81 = vector.broadcast %80 : vector<1x256xf32> to vector<8x256xf32>
    %82 = arith.mulf %79, %81 : vector<8x256xf32>
    %83 = tpu.concatenate %78, %23, %82 in 0 : vector<8x256xf32>, vector<8x256xf32>, vector<8x256xf32> -> vector<24x256xf32>
    %c0_33 = arith.constant 0 : index
    %c0_34 = arith.constant 0 : index
    %84 = vector.load %arg4[%c0_33, %c0_34] : memref<8x24xbf16, #tpu.memory_space<vmem>>, vector<8x24xbf16>
    %85 = arith.truncf %83 : vector<24x256xf32> to vector<24x256xbf16>
    %cst_35 = arith.constant dense<0.000000e+00> : vector<8x256xf32>
    %86 = tpu.matmul %84, %85, %cst_35 {dimension_numbers = #tpu.dot_dimension_numbers<[1], [0], [0], [1], [0, 0, 1, 1], [], []>} : vector<8x24xbf16>, vector<24x256xbf16>, vector<8x256xf32> -> vector<8x256xf32>
    %87 = vector.extract_strided_slice %0 {offsets = [56, 0], sizes = [8, 1], strides = [1, 1]} : vector<128x1xf32> to vector<8x1xf32>
    %88 = vector.broadcast %87 : vector<8x1xf32> to vector<8x256xf32>
    %89 = arith.addf %86, %88 : vector<8x256xf32>
    %cst_36 = arith.constant 0.000000e+00 : f32
    %90 = vector.broadcast %cst_36 : f32 to vector<8x256xf32>
    %91 = arith.cmpf oge, %89, %90 : vector<8x256xf32>
    %cst_37 = arith.constant 2.000000e-01 : f32
    %92 = vector.broadcast %cst_37 : f32 to vector<8x256xf32>
    %93 = arith.mulf %89, %92 : vector<8x256xf32>
    %94 = arith.select %91, %89, %93 : vector<8x256xi1>, vector<8x256xf32>
    %c51_i32 = arith.constant 51 : i32
    %95 = tpu.dynamic_rotate %94 by %c51_i32 dim 1 : vector<8x256xf32>, i32 -> vector<8x256xf32>
    %c8 = arith.constant 8 : index
    %c0_38 = arith.constant 0 : index
    %96 = vector.load %arg13[%c8, %c0_38] : memref<24x256xf32, #tpu.memory_space<vmem>>, vector<1x256xf32>
    %97 = vector.broadcast %96 : vector<1x256xf32> to vector<8x256xf32>
    %98 = arith.mulf %95, %97 : vector<8x256xf32>
    %c48_i32 = arith.constant 48 : i32
    %99 = tpu.dynamic_rotate %94 by %c48_i32 dim 1 : vector<8x256xf32>, i32 -> vector<8x256xf32>
    %c9 = arith.constant 9 : index
    %c0_39 = arith.constant 0 : index
    %100 = vector.load %arg13[%c9, %c0_39] : memref<24x256xf32, #tpu.memory_space<vmem>>, vector<1x256xf32>
    %101 = vector.broadcast %100 : vector<1x256xf32> to vector<8x256xf32>
    %102 = arith.mulf %99, %101 : vector<8x256xf32>
    %c45_i32 = arith.constant 45 : i32
    %103 = tpu.dynamic_rotate %94 by %c45_i32 dim 1 : vector<8x256xf32>, i32 -> vector<8x256xf32>
    %c10 = arith.constant 10 : index
    %c0_40 = arith.constant 0 : index
    %104 = vector.load %arg13[%c10, %c0_40] : memref<24x256xf32, #tpu.memory_space<vmem>>, vector<1x256xf32>
    %105 = vector.broadcast %104 : vector<1x256xf32> to vector<8x256xf32>
    %106 = arith.mulf %103, %105 : vector<8x256xf32>
    %c3_i32 = arith.constant 3 : i32
    %107 = tpu.dynamic_rotate %94 by %c3_i32 dim 1 : vector<8x256xf32>, i32 -> vector<8x256xf32>
    %c11 = arith.constant 11 : index
    %c0_41 = arith.constant 0 : index
    %108 = vector.load %arg13[%c11, %c0_41] : memref<24x256xf32, #tpu.memory_space<vmem>>, vector<1x256xf32>
    %109 = vector.broadcast %108 : vector<1x256xf32> to vector<8x256xf32>
    %110 = arith.mulf %107, %109 : vector<8x256xf32>
    %c253_i32 = arith.constant 253 : i32
    %111 = tpu.dynamic_rotate %94 by %c253_i32 dim 1 : vector<8x256xf32>, i32 -> vector<8x256xf32>
    %c12 = arith.constant 12 : index
    %c0_42 = arith.constant 0 : index
    %112 = vector.load %arg13[%c12, %c0_42] : memref<24x256xf32, #tpu.memory_space<vmem>>, vector<1x256xf32>
    %113 = vector.broadcast %112 : vector<1x256xf32> to vector<8x256xf32>
    %114 = arith.mulf %111, %113 : vector<8x256xf32>
    %c211_i32 = arith.constant 211 : i32
    %115 = tpu.dynamic_rotate %94 by %c211_i32 dim 1 : vector<8x256xf32>, i32 -> vector<8x256xf32>
    %c13 = arith.constant 13 : index
    %c0_43 = arith.constant 0 : index
    %116 = vector.load %arg13[%c13, %c0_43] : memref<24x256xf32, #tpu.memory_space<vmem>>, vector<1x256xf32>
    %117 = vector.broadcast %116 : vector<1x256xf32> to vector<8x256xf32>
    %118 = arith.mulf %115, %117 : vector<8x256xf32>
    %c208_i32 = arith.constant 208 : i32
    %119 = tpu.dynamic_rotate %94 by %c208_i32 dim 1 : vector<8x256xf32>, i32 -> vector<8x256xf32>
    %c14 = arith.constant 14 : index
    %c0_44 = arith.constant 0 : index
    %120 = vector.load %arg13[%c14, %c0_44] : memref<24x256xf32, #tpu.memory_space<vmem>>, vector<1x256xf32>
    %121 = vector.broadcast %120 : vector<1x256xf32> to vector<8x256xf32>
    %122 = arith.mulf %119, %121 : vector<8x256xf32>
    %c205_i32 = arith.constant 205 : i32
    %123 = tpu.dynamic_rotate %94 by %c205_i32 dim 1 : vector<8x256xf32>, i32 -> vector<8x256xf32>
    %c15 = arith.constant 15 : index
    %c0_45 = arith.constant 0 : index
    %124 = vector.load %arg13[%c15, %c0_45] : memref<24x256xf32, #tpu.memory_space<vmem>>, vector<1x256xf32>
    %125 = vector.broadcast %124 : vector<1x256xf32> to vector<8x256xf32>
    %126 = arith.mulf %123, %125 : vector<8x256xf32>
    %127 = tpu.concatenate %98, %102, %106, %110, %94, %114, %118, %122, %126 in 0 : vector<8x256xf32>, vector<8x256xf32>, vector<8x256xf32>, vector<8x256xf32>, vector<8x256xf32>, vector<8x256xf32>, vector<8x256xf32>, vector<8x256xf32>, vector<8x256xf32> -> vector<72x256xf32>
    %c0_46 = arith.constant 0 : index
    %c0_47 = arith.constant 0 : index
    %128 = vector.load %arg5[%c0_46, %c0_47] : memref<8x72xbf16, #tpu.memory_space<vmem>>, vector<8x72xbf16>
    %129 = arith.truncf %127 : vector<72x256xf32> to vector<72x256xbf16>
    %cst_48 = arith.constant dense<0.000000e+00> : vector<8x256xf32>
    %130 = tpu.matmul %128, %129, %cst_48 {dimension_numbers = #tpu.dot_dimension_numbers<[1], [0], [0], [1], [0, 0, 1, 1], [], []>} : vector<8x72xbf16>, vector<72x256xbf16>, vector<8x256xf32> -> vector<8x256xf32>
    %131 = vector.extract_strided_slice %0 {offsets = [64, 0], sizes = [8, 1], strides = [1, 1]} : vector<128x1xf32> to vector<8x1xf32>
    %132 = vector.broadcast %131 : vector<8x1xf32> to vector<8x256xf32>
    %133 = arith.addf %130, %132 : vector<8x256xf32>
    %c16_i32_49 = arith.constant 16 : i32
    %134 = tpu.dynamic_rotate %29 by %c16_i32_49 dim 1 : vector<8x256xf32>, i32 -> vector<8x256xf32>
    %c1_50 = arith.constant 1 : index
    %c0_51 = arith.constant 0 : index
    %135 = vector.load %arg13[%c1_50, %c0_51] : memref<24x256xf32, #tpu.memory_space<vmem>>, vector<1x256xf32>
    %136 = vector.broadcast %135 : vector<1x256xf32> to vector<8x256xf32>
    %137 = arith.mulf %134, %136 : vector<8x256xf32>
    %c240_i32_52 = arith.constant 240 : i32
    %138 = tpu.dynamic_rotate %29 by %c240_i32_52 dim 1 : vector<8x256xf32>, i32 -> vector<8x256xf32>
    %c6_53 = arith.constant 6 : index
    %c0_54 = arith.constant 0 : index
    %139 = vector.load %arg13[%c6_53, %c0_54] : memref<24x256xf32, #tpu.memory_space<vmem>>, vector<1x256xf32>
    %140 = vector.broadcast %139 : vector<1x256xf32> to vector<8x256xf32>
    %141 = arith.mulf %138, %140 : vector<8x256xf32>
    %142 = tpu.concatenate %137, %29, %141 in 0 : vector<8x256xf32>, vector<8x256xf32>, vector<8x256xf32> -> vector<24x256xf32>
    %c0_55 = arith.constant 0 : index
    %c0_56 = arith.constant 0 : index
    %143 = vector.load %arg6[%c0_55, %c0_56] : memref<8x24xbf16, #tpu.memory_space<vmem>>, vector<8x24xbf16>
    %144 = arith.truncf %142 : vector<24x256xf32> to vector<24x256xbf16>
    %cst_57 = arith.constant dense<0.000000e+00> : vector<8x256xf32>
    %145 = tpu.matmul %143, %144, %cst_57 {dimension_numbers = #tpu.dot_dimension_numbers<[1], [0], [0], [1], [0, 0, 1, 1], [], []>} : vector<8x24xbf16>, vector<24x256xbf16>, vector<8x256xf32> -> vector<8x256xf32>
    %146 = vector.extract_strided_slice %0 {offsets = [72, 0], sizes = [8, 1], strides = [1, 1]} : vector<128x1xf32> to vector<8x1xf32>
    %147 = vector.broadcast %146 : vector<8x1xf32> to vector<8x256xf32>
    %148 = arith.addf %145, %147 : vector<8x256xf32>
    %cst_58 = arith.constant 0.000000e+00 : f32
    %149 = vector.broadcast %cst_58 : f32 to vector<8x256xf32>
    %150 = arith.cmpf oge, %148, %149 : vector<8x256xf32>
    %cst_59 = arith.constant 2.000000e-01 : f32
    %151 = vector.broadcast %cst_59 : f32 to vector<8x256xf32>
    %152 = arith.mulf %148, %151 : vector<8x256xf32>
    %153 = arith.select %150, %148, %152 : vector<8x256xi1>, vector<8x256xf32>
    %c51_i32_60 = arith.constant 51 : i32
    %154 = tpu.dynamic_rotate %153 by %c51_i32_60 dim 1 : vector<8x256xf32>, i32 -> vector<8x256xf32>
    %c8_61 = arith.constant 8 : index
    %c0_62 = arith.constant 0 : index
    %155 = vector.load %arg13[%c8_61, %c0_62] : memref<24x256xf32, #tpu.memory_space<vmem>>, vector<1x256xf32>
    %156 = vector.broadcast %155 : vector<1x256xf32> to vector<8x256xf32>
    %157 = arith.mulf %154, %156 : vector<8x256xf32>
    %c48_i32_63 = arith.constant 48 : i32
    %158 = tpu.dynamic_rotate %153 by %c48_i32_63 dim 1 : vector<8x256xf32>, i32 -> vector<8x256xf32>
    %c9_64 = arith.constant 9 : index
    %c0_65 = arith.constant 0 : index
    %159 = vector.load %arg13[%c9_64, %c0_65] : memref<24x256xf32, #tpu.memory_space<vmem>>, vector<1x256xf32>
    %160 = vector.broadcast %159 : vector<1x256xf32> to vector<8x256xf32>
    %161 = arith.mulf %158, %160 : vector<8x256xf32>
    %c45_i32_66 = arith.constant 45 : i32
    %162 = tpu.dynamic_rotate %153 by %c45_i32_66 dim 1 : vector<8x256xf32>, i32 -> vector<8x256xf32>
    %c10_67 = arith.constant 10 : index
    %c0_68 = arith.constant 0 : index
    %163 = vector.load %arg13[%c10_67, %c0_68] : memref<24x256xf32, #tpu.memory_space<vmem>>, vector<1x256xf32>
    %164 = vector.broadcast %163 : vector<1x256xf32> to vector<8x256xf32>
    %165 = arith.mulf %162, %164 : vector<8x256xf32>
    %c3_i32_69 = arith.constant 3 : i32
    %166 = tpu.dynamic_rotate %153 by %c3_i32_69 dim 1 : vector<8x256xf32>, i32 -> vector<8x256xf32>
    %c11_70 = arith.constant 11 : index
    %c0_71 = arith.constant 0 : index
    %167 = vector.load %arg13[%c11_70, %c0_71] : memref<24x256xf32, #tpu.memory_space<vmem>>, vector<1x256xf32>
    %168 = vector.broadcast %167 : vector<1x256xf32> to vector<8x256xf32>
    %169 = arith.mulf %166, %168 : vector<8x256xf32>
    %c253_i32_72 = arith.constant 253 : i32
    %170 = tpu.dynamic_rotate %153 by %c253_i32_72 dim 1 : vector<8x256xf32>, i32 -> vector<8x256xf32>
    %c12_73 = arith.constant 12 : index
    %c0_74 = arith.constant 0 : index
    %171 = vector.load %arg13[%c12_73, %c0_74] : memref<24x256xf32, #tpu.memory_space<vmem>>, vector<1x256xf32>
    %172 = vector.broadcast %171 : vector<1x256xf32> to vector<8x256xf32>
    %173 = arith.mulf %170, %172 : vector<8x256xf32>
    %c211_i32_75 = arith.constant 211 : i32
    %174 = tpu.dynamic_rotate %153 by %c211_i32_75 dim 1 : vector<8x256xf32>, i32 -> vector<8x256xf32>
    %c13_76 = arith.constant 13 : index
    %c0_77 = arith.constant 0 : index
    %175 = vector.load %arg13[%c13_76, %c0_77] : memref<24x256xf32, #tpu.memory_space<vmem>>, vector<1x256xf32>
    %176 = vector.broadcast %175 : vector<1x256xf32> to vector<8x256xf32>
    %177 = arith.mulf %174, %176 : vector<8x256xf32>
    %c208_i32_78 = arith.constant 208 : i32
    %178 = tpu.dynamic_rotate %153 by %c208_i32_78 dim 1 : vector<8x256xf32>, i32 -> vector<8x256xf32>
    %c14_79 = arith.constant 14 : index
    %c0_80 = arith.constant 0 : index
    %179 = vector.load %arg13[%c14_79, %c0_80] : memref<24x256xf32, #tpu.memory_space<vmem>>, vector<1x256xf32>
    %180 = vector.broadcast %179 : vector<1x256xf32> to vector<8x256xf32>
    %181 = arith.mulf %178, %180 : vector<8x256xf32>
    %c205_i32_81 = arith.constant 205 : i32
    %182 = tpu.dynamic_rotate %153 by %c205_i32_81 dim 1 : vector<8x256xf32>, i32 -> vector<8x256xf32>
    %c15_82 = arith.constant 15 : index
    %c0_83 = arith.constant 0 : index
    %183 = vector.load %arg13[%c15_82, %c0_83] : memref<24x256xf32, #tpu.memory_space<vmem>>, vector<1x256xf32>
    %184 = vector.broadcast %183 : vector<1x256xf32> to vector<8x256xf32>
    %185 = arith.mulf %182, %184 : vector<8x256xf32>
    %186 = tpu.concatenate %157, %161, %165, %169, %153, %173, %177, %181, %185 in 0 : vector<8x256xf32>, vector<8x256xf32>, vector<8x256xf32>, vector<8x256xf32>, vector<8x256xf32>, vector<8x256xf32>, vector<8x256xf32>, vector<8x256xf32>, vector<8x256xf32> -> vector<72x256xf32>
    %c0_84 = arith.constant 0 : index
    %c0_85 = arith.constant 0 : index
    %187 = vector.load %arg7[%c0_84, %c0_85] : memref<8x72xbf16, #tpu.memory_space<vmem>>, vector<8x72xbf16>
    %188 = arith.truncf %186 : vector<72x256xf32> to vector<72x256xbf16>
    %cst_86 = arith.constant dense<0.000000e+00> : vector<8x256xf32>
    %189 = tpu.matmul %187, %188, %cst_86 {dimension_numbers = #tpu.dot_dimension_numbers<[1], [0], [0], [1], [0, 0, 1, 1], [], []>} : vector<8x72xbf16>, vector<72x256xbf16>, vector<8x256xf32> -> vector<8x256xf32>
    %190 = vector.extract_strided_slice %0 {offsets = [80, 0], sizes = [8, 1], strides = [1, 1]} : vector<128x1xf32> to vector<8x1xf32>
    %191 = vector.broadcast %190 : vector<8x1xf32> to vector<8x256xf32>
    %192 = arith.addf %189, %191 : vector<8x256xf32>
    %c1_i32_87 = arith.constant 1 : i32
    %193 = tpu.dynamic_rotate %35 by %c1_i32_87 dim 1 : vector<8x256xf32>, i32 -> vector<8x256xf32>
    %c3_88 = arith.constant 3 : index
    %c0_89 = arith.constant 0 : index
    %194 = vector.load %arg13[%c3_88, %c0_89] : memref<24x256xf32, #tpu.memory_space<vmem>>, vector<1x256xf32>
    %195 = vector.broadcast %194 : vector<1x256xf32> to vector<8x256xf32>
    %196 = arith.mulf %193, %195 : vector<8x256xf32>
    %c255_i32_90 = arith.constant 255 : i32
    %197 = tpu.dynamic_rotate %35 by %c255_i32_90 dim 1 : vector<8x256xf32>, i32 -> vector<8x256xf32>
    %c4_91 = arith.constant 4 : index
    %c0_92 = arith.constant 0 : index
    %198 = vector.load %arg13[%c4_91, %c0_92] : memref<24x256xf32, #tpu.memory_space<vmem>>, vector<1x256xf32>
    %199 = vector.broadcast %198 : vector<1x256xf32> to vector<8x256xf32>
    %200 = arith.mulf %197, %199 : vector<8x256xf32>
    %201 = tpu.concatenate %196, %35, %200 in 0 : vector<8x256xf32>, vector<8x256xf32>, vector<8x256xf32> -> vector<24x256xf32>
    %c0_93 = arith.constant 0 : index
    %c0_94 = arith.constant 0 : index
    %202 = vector.load %arg8[%c0_93, %c0_94] : memref<8x24xbf16, #tpu.memory_space<vmem>>, vector<8x24xbf16>
    %203 = arith.truncf %201 : vector<24x256xf32> to vector<24x256xbf16>
    %cst_95 = arith.constant dense<0.000000e+00> : vector<8x256xf32>
    %204 = tpu.matmul %202, %203, %cst_95 {dimension_numbers = #tpu.dot_dimension_numbers<[1], [0], [0], [1], [0, 0, 1, 1], [], []>} : vector<8x24xbf16>, vector<24x256xbf16>, vector<8x256xf32> -> vector<8x256xf32>
    %205 = vector.extract_strided_slice %0 {offsets = [88, 0], sizes = [8, 1], strides = [1, 1]} : vector<128x1xf32> to vector<8x1xf32>
    %206 = vector.broadcast %205 : vector<8x1xf32> to vector<8x256xf32>
    %207 = arith.addf %204, %206 : vector<8x256xf32>
    %cst_96 = arith.constant 0.000000e+00 : f32
    %208 = vector.broadcast %cst_96 : f32 to vector<8x256xf32>
    %209 = arith.cmpf oge, %207, %208 : vector<8x256xf32>
    %cst_97 = arith.constant 2.000000e-01 : f32
    %210 = vector.broadcast %cst_97 : f32 to vector<8x256xf32>
    %211 = arith.mulf %207, %210 : vector<8x256xf32>
    %212 = arith.select %209, %207, %211 : vector<8x256xi1>, vector<8x256xf32>
    %c16_i32_98 = arith.constant 16 : i32
    %213 = tpu.dynamic_rotate %212 by %c16_i32_98 dim 1 : vector<8x256xf32>, i32 -> vector<8x256xf32>
    %c1_99 = arith.constant 1 : index
    %c0_100 = arith.constant 0 : index
    %214 = vector.load %arg13[%c1_99, %c0_100] : memref<24x256xf32, #tpu.memory_space<vmem>>, vector<1x256xf32>
    %215 = vector.broadcast %214 : vector<1x256xf32> to vector<8x256xf32>
    %216 = arith.mulf %213, %215 : vector<8x256xf32>
    %c240_i32_101 = arith.constant 240 : i32
    %217 = tpu.dynamic_rotate %212 by %c240_i32_101 dim 1 : vector<8x256xf32>, i32 -> vector<8x256xf32>
    %c6_102 = arith.constant 6 : index
    %c0_103 = arith.constant 0 : index
    %218 = vector.load %arg13[%c6_102, %c0_103] : memref<24x256xf32, #tpu.memory_space<vmem>>, vector<1x256xf32>
    %219 = vector.broadcast %218 : vector<1x256xf32> to vector<8x256xf32>
    %220 = arith.mulf %217, %219 : vector<8x256xf32>
    %221 = tpu.concatenate %216, %212, %220 in 0 : vector<8x256xf32>, vector<8x256xf32>, vector<8x256xf32> -> vector<24x256xf32>
    %c0_104 = arith.constant 0 : index
    %c0_105 = arith.constant 0 : index
    %222 = vector.load %arg9[%c0_104, %c0_105] : memref<8x24xbf16, #tpu.memory_space<vmem>>, vector<8x24xbf16>
    %223 = arith.truncf %221 : vector<24x256xf32> to vector<24x256xbf16>
    %cst_106 = arith.constant dense<0.000000e+00> : vector<8x256xf32>
    %224 = tpu.matmul %222, %223, %cst_106 {dimension_numbers = #tpu.dot_dimension_numbers<[1], [0], [0], [1], [0, 0, 1, 1], [], []>} : vector<8x24xbf16>, vector<24x256xbf16>, vector<8x256xf32> -> vector<8x256xf32>
    %225 = vector.extract_strided_slice %0 {offsets = [96, 0], sizes = [8, 1], strides = [1, 1]} : vector<128x1xf32> to vector<8x1xf32>
    %226 = vector.broadcast %225 : vector<8x1xf32> to vector<8x256xf32>
    %227 = arith.addf %224, %226 : vector<8x256xf32>
    %cst_107 = arith.constant 0.000000e+00 : f32
    %228 = vector.broadcast %cst_107 : f32 to vector<8x256xf32>
    %229 = arith.cmpf oge, %227, %228 : vector<8x256xf32>
    %cst_108 = arith.constant 2.000000e-01 : f32
    %230 = vector.broadcast %cst_108 : f32 to vector<8x256xf32>
    %231 = arith.mulf %227, %230 : vector<8x256xf32>
    %232 = arith.select %229, %227, %231 : vector<8x256xi1>, vector<8x256xf32>
    %c85_i32 = arith.constant 85 : i32
    %233 = tpu.dynamic_rotate %232 by %c85_i32 dim 1 : vector<8x256xf32>, i32 -> vector<8x256xf32>
    %c16 = arith.constant 16 : index
    %c0_109 = arith.constant 0 : index
    %234 = vector.load %arg13[%c16, %c0_109] : memref<24x256xf32, #tpu.memory_space<vmem>>, vector<1x256xf32>
    %235 = vector.broadcast %234 : vector<1x256xf32> to vector<8x256xf32>
    %236 = arith.mulf %233, %235 : vector<8x256xf32>
    %c80_i32 = arith.constant 80 : i32
    %237 = tpu.dynamic_rotate %232 by %c80_i32 dim 1 : vector<8x256xf32>, i32 -> vector<8x256xf32>
    %c17 = arith.constant 17 : index
    %c0_110 = arith.constant 0 : index
    %238 = vector.load %arg13[%c17, %c0_110] : memref<24x256xf32, #tpu.memory_space<vmem>>, vector<1x256xf32>
    %239 = vector.broadcast %238 : vector<1x256xf32> to vector<8x256xf32>
    %240 = arith.mulf %237, %239 : vector<8x256xf32>
    %c75_i32 = arith.constant 75 : i32
    %241 = tpu.dynamic_rotate %232 by %c75_i32 dim 1 : vector<8x256xf32>, i32 -> vector<8x256xf32>
    %c18 = arith.constant 18 : index
    %c0_111 = arith.constant 0 : index
    %242 = vector.load %arg13[%c18, %c0_111] : memref<24x256xf32, #tpu.memory_space<vmem>>, vector<1x256xf32>
    %243 = vector.broadcast %242 : vector<1x256xf32> to vector<8x256xf32>
    %244 = arith.mulf %241, %243 : vector<8x256xf32>
    %c5_i32 = arith.constant 5 : i32
    %245 = tpu.dynamic_rotate %232 by %c5_i32 dim 1 : vector<8x256xf32>, i32 -> vector<8x256xf32>
    %c19 = arith.constant 19 : index
    %c0_112 = arith.constant 0 : index
    %246 = vector.load %arg13[%c19, %c0_112] : memref<24x256xf32, #tpu.memory_space<vmem>>, vector<1x256xf32>
    %247 = vector.broadcast %246 : vector<1x256xf32> to vector<8x256xf32>
    %248 = arith.mulf %245, %247 : vector<8x256xf32>
    %c251_i32 = arith.constant 251 : i32
    %249 = tpu.dynamic_rotate %232 by %c251_i32 dim 1 : vector<8x256xf32>, i32 -> vector<8x256xf32>
    %c20 = arith.constant 20 : index
    %c0_113 = arith.constant 0 : index
    %250 = vector.load %arg13[%c20, %c0_113] : memref<24x256xf32, #tpu.memory_space<vmem>>, vector<1x256xf32>
    %251 = vector.broadcast %250 : vector<1x256xf32> to vector<8x256xf32>
    %252 = arith.mulf %249, %251 : vector<8x256xf32>
    %c181_i32 = arith.constant 181 : i32
    %253 = tpu.dynamic_rotate %232 by %c181_i32 dim 1 : vector<8x256xf32>, i32 -> vector<8x256xf32>
    %c21 = arith.constant 21 : index
    %c0_114 = arith.constant 0 : index
    %254 = vector.load %arg13[%c21, %c0_114] : memref<24x256xf32, #tpu.memory_space<vmem>>, vector<1x256xf32>
    %255 = vector.broadcast %254 : vector<1x256xf32> to vector<8x256xf32>
    %256 = arith.mulf %253, %255 : vector<8x256xf32>
    %c176_i32 = arith.constant 176 : i32
    %257 = tpu.dynamic_rotate %232 by %c176_i32 dim 1 : vector<8x256xf32>, i32 -> vector<8x256xf32>
    %c22 = arith.constant 22 : index
    %c0_115 = arith.constant 0 : index
    %258 = vector.load %arg13[%c22, %c0_115] : memref<24x256xf32, #tpu.memory_space<vmem>>, vector<1x256xf32>
    %259 = vector.broadcast %258 : vector<1x256xf32> to vector<8x256xf32>
    %260 = arith.mulf %257, %259 : vector<8x256xf32>
    %c171_i32 = arith.constant 171 : i32
    %261 = tpu.dynamic_rotate %232 by %c171_i32 dim 1 : vector<8x256xf32>, i32 -> vector<8x256xf32>
    %c23 = arith.constant 23 : index
    %c0_116 = arith.constant 0 : index
    %262 = vector.load %arg13[%c23, %c0_116] : memref<24x256xf32, #tpu.memory_space<vmem>>, vector<1x256xf32>
    %263 = vector.broadcast %262 : vector<1x256xf32> to vector<8x256xf32>
    %264 = arith.mulf %261, %263 : vector<8x256xf32>
    %265 = tpu.concatenate %236, %240, %244, %248, %232, %252, %256, %260, %264 in 0 : vector<8x256xf32>, vector<8x256xf32>, vector<8x256xf32>, vector<8x256xf32>, vector<8x256xf32>, vector<8x256xf32>, vector<8x256xf32>, vector<8x256xf32>, vector<8x256xf32> -> vector<72x256xf32>
    %c0_117 = arith.constant 0 : index
    %c0_118 = arith.constant 0 : index
    %266 = vector.load %arg10[%c0_117, %c0_118] : memref<8x72xbf16, #tpu.memory_space<vmem>>, vector<8x72xbf16>
    %267 = arith.truncf %265 : vector<72x256xf32> to vector<72x256xbf16>
    %cst_119 = arith.constant dense<0.000000e+00> : vector<8x256xf32>
    %268 = tpu.matmul %266, %267, %cst_119 {dimension_numbers = #tpu.dot_dimension_numbers<[1], [0], [0], [1], [0, 0, 1, 1], [], []>} : vector<8x72xbf16>, vector<72x256xbf16>, vector<8x256xf32> -> vector<8x256xf32>
    %269 = vector.extract_strided_slice %0 {offsets = [104, 0], sizes = [8, 1], strides = [1, 1]} : vector<128x1xf32> to vector<8x1xf32>
    %270 = vector.broadcast %269 : vector<8x1xf32> to vector<8x256xf32>
    %271 = arith.addf %268, %270 : vector<8x256xf32>
    %272 = tpu.concatenate %74, %133, %192, %271 in 0 : vector<8x256xf32>, vector<8x256xf32>, vector<8x256xf32>, vector<8x256xf32> -> vector<32x256xf32>
    %273 = arith.truncf %272 : vector<32x256xf32> to vector<32x256xbf16>
    %c0_120 = arith.constant 0 : index
    %c0_121 = arith.constant 0 : index
    %274 = vector.load %arg11[%c0_120, %c0_121] : memref<16x32xbf16, #tpu.memory_space<vmem>>, vector<16x32xbf16>
    %cst_122 = arith.constant dense<0.000000e+00> : vector<16x256xf32>
    %275 = tpu.matmul %274, %273, %cst_122 {dimension_numbers = #tpu.dot_dimension_numbers<[1], [0], [0], [1], [0, 0, 1, 1], [], []>} : vector<16x32xbf16>, vector<32x256xbf16>, vector<16x256xf32> -> vector<16x256xf32>
    %276 = vector.extract_strided_slice %0 {offsets = [112, 0], sizes = [16, 1], strides = [1, 1]} : vector<128x1xf32> to vector<16x1xf32>
    %277 = vector.broadcast %276 : vector<16x1xf32> to vector<16x256xf32>
    %278 = arith.addf %275, %277 : vector<16x256xf32>
    %279 = arith.addf %278, %11 : vector<16x256xf32>
    %c0_123 = arith.constant 0 : index
    %c0_124 = arith.constant 0 : index
    %c0_125 = arith.constant 0 : index
    %280 = vector.load %arg14[%c0_123, %c0_124, %c0_125] : memref<1x16x256xf32, #tpu.memory_space<vmem>>, vector<1x16x256xf32>
    %281 = vector.shape_cast %280 : vector<1x16x256xf32> to vector<16x256xf32>
    %282 = vector.shape_cast %279 : vector<16x256xf32> to vector<1x16x256xf32>
    tpu.vector_store %arg14[%c0_123, %c0_124, %c0_125], %282 {strides = array<i32>} : memref<1x16x256xf32, #tpu.memory_space<vmem>>, vector<1x16x256xf32>,
    return
  }
  func.func @transform_0(%arg0: i32) -> (i32, i32, i32) {
    %c0_i32 = arith.constant 0 : i32
    %c0_i32_0 = arith.constant 0 : i32
    %c0_i32_1 = arith.constant 0 : i32
    return %arg0, %c0_i32, %c0_i32_0 : i32, i32, i32
  }
  func.func @transform_1(%arg0: i32) -> (i32, i32) {
    %c0_i32 = arith.constant 0 : i32
    %c0_i32_0 = arith.constant 0 : i32
    %c0_i32_1 = arith.constant 0 : i32
    return %c0_i32, %c0_i32_0 : i32, i32
  }
  func.func @transform_2(%arg0: i32) -> (i32, i32) {
    %c0_i32 = arith.constant 0 : i32
    %c0_i32_0 = arith.constant 0 : i32
    %c0_i32_1 = arith.constant 0 : i32
    return %c0_i32, %c0_i32_0 : i32, i32
  }
  func.func @transform_3(%arg0: i32) -> (i32, i32) {
    %c0_i32 = arith.constant 0 : i32
    %c0_i32_0 = arith.constant 0 : i32
    %c0_i32_1 = arith.constant 0 : i32
    return %c0_i32, %c0_i32_0 : i32, i32
  }
  func.func @transform_4(%arg0: i32) -> (i32, i32) {
    %c0_i32 = arith.constant 0 : i32
    %c0_i32_0 = arith.constant 0 : i32
    %c0_i32_1 = arith.constant 0 : i32
    return %c0_i32, %c0_i32_0 : i32, i32
  }
  func.func @transform_5(%arg0: i32) -> (i32, i32) {
    %c0_i32 = arith.constant 0 : i32
    %c0_i32_0 = arith.constant 0 : i32
    %c0_i32_1 = arith.constant 0 : i32
    return %c0_i32, %c0_i32_0 : i32, i32
  }
  func.func @transform_6(%arg0: i32) -> (i32, i32) {
    %c0_i32 = arith.constant 0 : i32
    %c0_i32_0 = arith.constant 0 : i32
    %c0_i32_1 = arith.constant 0 : i32
    return %c0_i32, %c0_i32_0 : i32, i32
  }
  func.func @transform_7(%arg0: i32) -> (i32, i32) {
    %c0_i32 = arith.constant 0 : i32
    %c0_i32_0 = arith.constant 0 : i32
    %c0_i32_1 = arith.constant 0 : i32
    return %c0_i32, %c0_i32_0 : i32, i32
  }
  func.func @transform_8(%arg0: i32) -> (i32, i32) {
    %c0_i32 = arith.constant 0 : i32
    %c0_i32_0 = arith.constant 0 : i32
    %c0_i32_1 = arith.constant 0 : i32
    return %c0_i32, %c0_i32_0 : i32, i32
  }
  func.func @transform_9(%arg0: i32) -> (i32, i32) {
    %c0_i32 = arith.constant 0 : i32
    %c0_i32_0 = arith.constant 0 : i32
    %c0_i32_1 = arith.constant 0 : i32
    return %c0_i32, %c0_i32_0 : i32, i32
  }
  func.func @transform_10(%arg0: i32) -> (i32, i32) {
    %c0_i32 = arith.constant 0 : i32
    %c0_i32_0 = arith.constant 0 : i32
    %c0_i32_1 = arith.constant 0 : i32
    return %c0_i32, %c0_i32_0 : i32, i32
  }
  func.func @transform_11(%arg0: i32) -> (i32, i32) {
    %c0_i32 = arith.constant 0 : i32
    %c0_i32_0 = arith.constant 0 : i32
    %c0_i32_1 = arith.constant 0 : i32
    return %c0_i32, %c0_i32_0 : i32, i32
  }
  func.func @transform_12(%arg0: i32) -> (i32, i32) {
    %c0_i32 = arith.constant 0 : i32
    %c0_i32_0 = arith.constant 0 : i32
    %c0_i32_1 = arith.constant 0 : i32
    return %c0_i32, %c0_i32_0 : i32, i32
  }
  func.func @transform_13(%arg0: i32) -> (i32, i32, i32) {
    %c0_i32 = arith.constant 0 : i32
    %c0_i32_0 = arith.constant 0 : i32
    %c0_i32_1 = arith.constant 0 : i32
    return %arg0, %c0_i32, %c0_i32_0 : i32, i32, i32
  }
}

</mosaic_0001>

<bundles_post_ra>
// kernel: receptive_field_block.1
= control target key start
LH: loop header
LB: loop body
LE: loop exit
PB: predicated region body
PF: predicated region fallthrough
CT: control target
= control target key end

     0   :  { %s1854_s25 = smov 0   ;;  %s2538_s0 = inlined_call_operand.vmem [shape: f32[2,16,256], index: 0, kind: input, shape index: {}]   ;;  %s2539_s1 = inlined_call_operand.vmem [shape: bf16[48,16], index: 1, kind: input, shape index: {}]   ;;  %s2540_s2 = inlined_call_operand.vmem [shape: bf16[8,72], index: 2, kind: input, shape index: {}]   ;;  %s2541_s3 = inlined_call_operand.vmem [shape: bf16[8,24], index: 3, kind: input, shape index: {}]   ;;  %s2542_s4 = inlined_call_operand.vmem [shape: bf16[8,72], index: 4, kind: input, shape index: {}]   ;;  %s2543_s5 = inlined_call_operand.vmem [shape: bf16[8,24], index: 5, kind: input, shape index: {}]   ;;  %s2544_s6 = inlined_call_operand.vmem [shape: bf16[8,72], index: 6, kind: input, shape index: {}]   ;;  %s2545_s7 = inlined_call_operand.vmem [shape: bf16[8,24], index: 7, kind: input, shape index: {}]   ;;  %s2546_s8 = inlined_call_operand.vmem [shape: bf16[8,24], index: 8, kind: input, shape index: {}]   ;;  %s2547_s9 = inlined_call_operand.vmem [shape: bf16[8,72], index: 9, kind: input, shape index: {}]   ;;  %s2548_s10 = inlined_call_operand.vmem [shape: bf16[16,32], index: 10, kind: input, shape index: {}]   ;;  %s2549_s11 = inlined_call_operand.vmem [shape: f32[128,1], index: 11, kind: input, shape index: {}]   ;;  %s2550_s12 = inlined_call_operand.vmem [shape: f32[24,256], index: 12, kind: input, shape index: {}]   ;;  %s2551_s13 = inlined_call_operand.vmem [shape: f32[2,16,256], index: 13, kind: output, shape index: {}]  }
   0x1 LB: > { %s1639_s26 = sadd.s32 4294967295, %s1759_s25   ;;  %p1643_p0 = scmp.ge.s32.totalorder %s1759_s25, 1  ;;  %s1759_s25 = sphi %s1854_s25, %s23_s25  }
   0x2   : > { %p387_p1 = scmp.lt.s32.totalorder %s1759_s25, 3 }
   0x4   : > { %p388_p2 = pnand %p1643_p0, %p387_p1 }
   0x5   : > { %p431_p3 = scmp.lt.s32.totalorder (!%p388_p2), %s1639_s26, 1  ;;  %s1762_s14 = smov (!%p388_p2), 111  }
   0x6   : > { %391 = sbr.rel (%p388_p2) target bundleno = 1230 (0x4ce), region = 72  ;;  %s1764_s16 = smov (!%p388_p2), 112  }
   0x7   : > { %s1765_s17 = smov (!%p388_p2), 127   ;;  %s1766_s18 = smov (!%p388_p2), 15  }
   0x8   : > { %s1767_s19 = smov (!%p388_p2), 1   ;;  %s1768_s20 = smov (!%p388_p2), 16  }
   0x9   : > { %s1769_s21 = smov (!%p388_p2), 17   ;;  %s1774_s22 = smov (!%p388_p2), 45  }
   0xa   : > { %s1775_s23 = smov (!%p388_p2), 3   ;;  %s1776_s24 = smov (!%p388_p2), 51  }
   0xb   : > { %v444_v0 = vld [vmem:[%s2549_s11 + $0x10] sm:$0xff]  ;;  %v1761_v1 = vmov 0   ;;  %s2553_s26 = smov (!%p431_p3, %s1639_s26), 1  ;;  %v445_v7 = vld [vmem:[%s2549_s11 + $0x18] sm:$0xff]  ;;  %v1715_v9 = vld [vmem:[%s2539_s1] sm:$0xff]  ;;  %vm515_vm0 = vcmask 130048   ;;  %v605_v56 = vlaneseq }
   0xc   : > { %1750 = vset.pattern.permute.xlu0 %v1761_v1  ;;  %1751 = vset.pattern.permute.xlu1 %v1761_v1  ;;  %s1713_s29 = sshll.u32 %s2553_s26, 5  ;;  %v446_v10 = vld [vmem:[%s2549_s11 + $0x20] sm:$0xff]  ;;  %v447_v11 = vld [vmem:[%s2549_s11 + $0x28] sm:$0xff]  ;;  %v1717_v13 = vld [vmem:[%s2539_s1 + $0x10] sm:$0xff]  ;;  %vm750_vm10 = vcmask 1043456   ;;  %s1777_s27 = smov 48  }
   0xd   : > { %482 = vperm.xlu0 %1750, %v444_v0   ;;  %1752 = vset.pattern.permute.xlu2 %v1761_v1  ;;  %s435_s15 = scalar_lea.vmem %s2538_s0, %s1713_s29  ;;  %v1716_v12 = vld [vmem:[%s2539_s1 + $0x8] sm:$0xff]  ;;  %v1963_v58 = vand.u32 127, %v605_v56  ;;  %s1778_s28 = smov 43  }
   0xe   : > { %v458_v2 = vld [vmem:[%s435_s15] sm:$0xff]  ;;  %v460_v3 = vld [vmem:[%s435_s15 + $0x10] sm:$0xff]  ;;  %v459_v4 = vld [vmem:[%s435_s15 + $0x8] sm:$0xff]  ;;  %492 = vperm.xlu1 %1751, %v446_v10   ;;  %s1779_s30 = smov 53  }
   0xf   : > { %v462_v5 = vpack.c.bf16 %v460_v3, %v458_v2  ;;  %v461_v6 = vld [vmem:[%s435_s15 + $0x18] sm:$0xff]  ;;  %s1763_s15 = smov 113   ;;  %v1672_v59 = vld [vmem:[%s2550_s12 + $0x7] ss:$8 sm:$0x3]  ;;  %vm718_vm9 = vcmp.lt.s32.totalorder %v1963_v58, 111 }
  0x10   : > { %v463_v8 = vpack.c.bf16 %v461_v6, %v459_v4  ;;  %v724_v60 = vperm.slane %v1672_v59, 0  ;;  %v725_v61 = vperm.slane %v1672_v59, 1  ;;  %v1670_v2 = vld [vmem:[%s2550_s12 + $0x5] ss:$8 sm:$0x3]  ;;  %vm686_vm11 = vcmp.lt.s32.totalorder %v1963_v58, 113 }
  0x11   : > { %532 = vmatpush.bf16.msra.mxu0 %v462_v5  ;;  %v1671_v5 = vld [vmem:[%s2550_s12 + $0x6] ss:$8 sm:$0x3]  ;;  %v693_v10 = vperm.slane %v1670_v2, 1  ;;  %vm702_vm12 = vcmp.lt.s32.totalorder %v1963_v58, 112  ;;  %vm670_vm13 = vcmp.lt.s32.totalorder %v1963_v58, 127 }
  0x12   : > { %556 = vmatpush.bf16.msra.mxu1 %v463_v8  ;;  %vm638_vm14 = vcmp.lt.s32.totalorder %v1963_v58, 15  ;;  %vm654_vm15 = vcmp.lt.s32.totalorder %v1963_v58, 1 }
  0x14   : > { %1660 = vmatmul.msk.bf16.vlgmr.msra.gmra.mxu0 %vm515_vm0, %v1715_v9 }
  0x15   : > { %487 = vperm.xlu0 %1750, %v445_v7   ;;  %1663 = vmatmul.msk.bf16.vlgmr.msra.gmra.mxu1 %vm515_vm0, %v1715_v9  ;;  %v692_v9 = vperm.slane %v1670_v2, 0 }
  0x1d   : > { %497 = vperm.xlu0 %1750, %v447_v11  }
  0x24   : > { %1661 = vmatmul.msk.bf16.gmra.mxu0 %vm515_vm0, %v1716_v12 }
  0x25   : > { %1664 = vmatmul.msk.bf16.gmra.mxu1 %vm515_vm0, %v1716_v12 }
  0x34   : > { %1662 = vmatmul.msk.bf16.gmra.mxu0 %vm515_vm0, %v1717_v13 }
  0x35   : > { %1665 = vmatmul.msk.bf16.gmra.mxu1 %vm515_vm0, %v1717_v13  ;;  %v1979_v13 = vperm.slane %v1671_v5, 0  ;;  %vm607_vm0 = vcmp.lt.s32.totalorder %v1963_v58, 17 }
  0x7f   : > { %v483_v18 = vpop.permute.xlu0 %482 }
  0x80   : > { %v493_v31 = vpop.permute.xlu1 %492 }
  0x87   : > { %v488_v29 = vpop.permute.xlu0 %487 }
  0x8f   : > { %v498_v45 = vpop.permute.xlu0 %497 }
  0x91   : > { %v1891_v14 = vpop.f32.mrf.mxu0 }
  0x92   : > { %v1893_v15 = vpop.f32.mrf.mxu1 }
  0x99   : > { %v1895_v16 = vpop.f32.mrf.mxu0 }
  0x9a   : > { %v1897_v17 = vpop.f32.mrf.mxu1 }
  0xa1   : > { %v539_v19 = vpop.f32.mrf.mxu0 }
  0xa2   : > { %v540_v20 = vadd.f32 %v539_v19, %v483_v18  ;;  %v563_v21 = vpop.f32.mrf.mxu1 }
  0xa3   : > { %v564_v22 = vadd.f32 %v563_v21, %v483_v18  ;;  %v1981_v18 = vperm.slane %v1671_v5, 1 }
  0xa4   : > { %vm577_vm1 = vcmp.ge.f32.partialorder %v540_v20, 0.0  ;;  %v579_v23 = vmul.f32 0.2, %v540_v20 }
  0xa5   : > { %vm578_vm2 = vcmp.ge.f32.partialorder %v564_v22, 0.0  ;;  %v580_v24 = vmul.f32 0.2, %v564_v22 }
  0xa6   : > { %v1899_v25 = vsel %vm577_vm1, %v540_v20, %v579_v23  ;;  %vm622_vm1 = vcmp.lt.s32.totalorder %v1963_v58, 16 }
  0xa7   : > { %v1901_v26 = vsel %vm578_vm2, %v564_v22, %v580_v24  ;;  %714 = vrot.lane.b32.xlu1 %v1899_v25, %s1762_s14  ;;  %vm746_vm2 = vcmask 588800  }
  0xa8   : > { %684 = vrot.lane.b32.xlu0 %v1901_v26, %s1763_s15  ;;  %716 = vrot.lane.b32.xlu2 %v1901_v26, %s1762_s14  ;;  %s1780_s14 = smov 123  }
  0xa9   : > { %v541_v27 = vpop.f32.mrf.mxu0 }
  0xaa   : > { %v565_v28 = vpop.f32.mrf.mxu1  ;;  %v542_v40 = vadd.f32 %v541_v27, %v488_v29 }
  0xab   : > { %v566_v30 = vadd.f32 %v565_v28, %v488_v29 }
  0xac   : > { %v585_v42 = vmul.f32 0.2, %v542_v40  ;;  %vm583_vm6 = vcmp.ge.f32.partialorder %v542_v40, 0.0 }
  0xad   : > { %v586_v32 = vmul.f32 0.2, %v566_v30  ;;  %vm584_vm3 = vcmp.ge.f32.partialorder %v566_v30, 0.0 }
  0xae   : > { %v1937_v46 = vsel %vm583_vm6, %v542_v40, %v585_v42 }
  0xaf   : > { %698 = vrot.lane.b32.xlu1 %v1899_v25, %s1764_s16  ;;  %v1921_v35 = vsel %vm584_vm3, %v566_v30, %v586_v32  ;;  %vm809_vm3 = vcmask 195584  }
  0xb0   : > { %666 = vrot.lane.b32.xlu0 %v1899_v25, %s1765_s17  ;;  %682 = vrot.lane.b32.xlu2 %v1899_v25, %s1763_s15 }
  0xb1   : > { %v544_v33 = vpop.f32.mrf.mxu0 }
  0xb2   : > { %v545_v34 = vadd.f32 %v544_v33, %v493_v31  ;;  %v568_v37 = vpop.f32.mrf.mxu1 }
  0xb3   : > { %v569_v38 = vadd.f32 %v568_v37, %v493_v31  ;;  %v1669_v31 = vld [vmem:[%s2550_s12 + $0x4] ss:$8 sm:$0x3] }
  0xb4   : > { %v591_v36 = vmul.f32 0.2, %v545_v34  ;;  %vm589_vm4 = vcmp.ge.f32.partialorder %v545_v34, 0.0  ;;  %v1995_v37 = vperm.slane %v1669_v31, 1 }
  0xb5   : > { %v592_v41 = vmul.f32 0.2, %v569_v38  ;;  %vm590_vm5 = vcmp.ge.f32.partialorder %v569_v38, 0.0 }
  0xb6   : > { %v1928_v39 = vsel %vm589_vm4, %v545_v34, %v591_v36  ;;  %v1993_v36 = vperm.slane %v1669_v31, 0 }
  0xb7   : > { %668 = vrot.lane.b32.xlu1 %v1901_v26, %s1765_s17  ;;  %v1935_v44 = vsel %vm590_vm5, %v569_v38, %v592_v41 }
  0xb8   : > { %636 = vrot.lane.b32.xlu0 %v1901_v26, %s1766_s18  ;;  %700 = vrot.lane.b32.xlu2 %v1901_v26, %s1764_s16 }
  0xb9   : > { %v546_v43 = vpop.f32.mrf.mxu0 }
  0xba   : > { %v547_v47 = vadd.f32 %v546_v43, %v498_v45  ;;  %v570_v50 = vpop.f32.mrf.mxu1  ;;  %v1667_v43 = vld [vmem:[%s2550_s12 + $0x2] ss:$8 sm:$0x3] }
  0xbb   : > { %v571_v51 = vadd.f32 %v570_v50, %v498_v45 }
  0xbc   : > { %v597_v48 = vmul.f32 0.2, %v547_v47  ;;  %vm595_vm7 = vcmp.ge.f32.partialorder %v547_v47, 0.0 }
  0xbd   : > { %v598_v52 = vmul.f32 0.2, %v571_v51  ;;  %vm596_vm8 = vcmp.ge.f32.partialorder %v571_v51, 0.0 }
  0xbe   : > { %v1945_v49 = vsel %vm595_vm7, %v547_v47, %v597_v48  ;;  %v1668_v48 = vld [vmem:[%s2550_s12 + $0x3] ss:$8 sm:$0x3] }
  0xbf   : > { %650 = vrot.lane.b32.xlu1 %v1899_v25, %s1767_s19  ;;  %v1957_v53 = vsel %vm596_vm8, %v571_v51, %v598_v52  ;;  %v644_v52 = vperm.slane %v1667_v43, 0  ;;  %v2015_v56 = vperm.slane %v1668_v48, 1 }
  0xc0   : > { %618 = vrot.lane.b32.xlu0 %v1899_v25, %s1768_s20  ;;  %634 = vrot.lane.b32.xlu2 %v1899_v25, %s1766_s18  ;;  %s1771_s18 = smov 83  }
  0xc7   : > { %601 = vrot.lane.b32.xlu1 %v1899_v25, %s1769_s21 }
  0xc8   : > { %793 = vrot.lane.b32.xlu0 %v1921_v35, %s1765_s17  ;;  %652 = vrot.lane.b32.xlu2 %v1901_v26, %s1767_s19 }
  0xcf   : > { %620 = vrot.lane.b32.xlu1 %v1901_v26, %s1768_s20 }
  0xd0   : > { %1038 = vrot.lane.b32.xlu0 %v1928_v39, %s1764_s16  ;;  %603 = vrot.lane.b32.xlu2 %v1901_v26, %s1769_s21  ;;  %s1773_s21 = smov 125  }
  0xd7   : > { %783 = vrot.lane.b32.xlu1 %v1937_v46, %s1767_s19 }
  0xd8   : > { %1032 = vrot.lane.b32.xlu0 %v1935_v44, %s1768_s20  ;;  %791 = vrot.lane.b32.xlu2 %v1937_v46, %s1765_s17 }
  0xdf   : > { %1040 = vrot.lane.b32.xlu1 %v1935_v44, %s1764_s16 }
  0xe0   : > { %1212 = vrot.lane.b32.xlu0 %v1945_v49, %s1767_s19  ;;  %785 = vrot.lane.b32.xlu2 %v1921_v35, %s1767_s19 }
  0xe7   : > { %1220 = vrot.lane.b32.xlu1 %v1945_v49, %s1765_s17 }
  0xe8   : > { %1030 = vrot.lane.b32.xlu2 %v1928_v39, %s1768_s20 }
  0xef   : > { %1214 = vrot.lane.b32.xlu1 %v1957_v53, %s1767_s19  ;;  %s1772_s19 = smov 80  }
  0xf0   : > { %1222 = vrot.lane.b32.xlu2 %v1957_v53, %s1765_s17  ;;  %s1770_s17 = smov 77  }
 0x102   : > { %v717_v54 = vpop.permute.xlu2 %716 }
 0x10a   : > { %v683_v55 = vpop.permute.xlu2 %682 }
 0x112   : > { %v701_v57 = vpop.permute.xlu2 %700 }
 0x119   : > { %v715_v62 = vpop.permute.xlu1 %714 }
 0x11a   : > { %v685_v63 = vpop.permute.xlu0 %684  ;;  %v719_v0 = vsel %vm718_vm9, %v715_v62, %v717_v54  ;;  %v720_v1 = vsel %vm718_vm9, %v717_v54, %v715_v62  ;;  %v635_v6 = vpop.permute.xlu2 %634  ;;  %v645_v54 = vperm.slane %v1667_v43, 1 }
 0x11b   : > { %v728_v3 = vmul.f32 %v724_v60, %v719_v0  ;;  %v729_v4 = vmul.f32 %v725_v61, %v720_v1  ;;  %v687_v19 = vsel %vm686_vm11, %v683_v55, %v685_v63  ;;  %v688_v20 = vsel %vm686_vm11, %v685_v63, %v683_v55 }
 0x11c   : > { %v696_v27 = vmul.f32 %v692_v9, %v687_v19  ;;  %v697_v28 = vmul.f32 %v693_v10, %v688_v20  ;;  %v2013_v55 = vperm.slane %v1668_v48, 0  ;;  %v1666_v9 = vld [vmem:[%s2550_s12 + $0x1] ss:$8 sm:$0x3]  ;;  %vm967_vm11 = vcmp.lt.s32.totalorder %v1963_v58, 77 }
 0x11d   : > { %v739_v7 = vpack.c.bf16 %v728_v3, %v728_v3  ;;  %v740_v8 = vpack.c.bf16 %v729_v4, %v729_v4  ;;  %v2035_v20 = vperm.slane %v1666_v9, 0 }
 0x11f   : > { %v752_v11 = vsel %vm750_vm10, %v739_v7, 0  ;;  %v755_v12 = vsel %vm750_vm10, %v740_v8, 0  ;;  %v610_v7 = vld [vmem:[%s2550_s12] ss:$8 sm:$0x3] }
 0x120   : > { %760 = vmatpush.bf16.msra.mxu2 %v752_v11  ;;  %773 = vmatpush.bf16.msra.mxu3 %v755_v12  ;;  %v612_v12 = vperm.slane %v610_v7, 0  ;;  %v613_v19 = vperm.slane %v610_v7, 1 }
 0x121   : > { %v699_v21 = vpop.permute.xlu1 %698 }
 0x122   : > { %v667_v22 = vpop.permute.xlu0 %666  ;;  %v703_v23 = vsel %vm702_vm12, %v699_v21, %v701_v57  ;;  %v704_v24 = vsel %vm702_vm12, %v701_v57, %v699_v21  ;;  %v653_v34 = vpop.permute.xlu2 %652  ;;  %v2037_v21 = vperm.slane %v1666_v9, 1  ;;  %v799_v9 = vld [vmem:[%s2541_s3] sm:$0xf] }
 0x123   : > { %v712_v29 = vmul.f32 %v1979_v13, %v703_v23  ;;  %v713_v30 = vmul.f32 %v1981_v18, %v704_v24 }
 0x125   : > { %v737_v32 = vpack.c.bf16 %v712_v29, %v696_v27  ;;  %v738_v33 = vpack.c.bf16 %v713_v30, %v697_v28 }
 0x127   : > { %761 = vmatpush.bf16.msra.mxu2 %v737_v32  ;;  %774 = vmatpush.bf16.msra.mxu3 %v738_v33 }
 0x129   : > { %v669_v38 = vpop.permute.xlu1 %668 }
 0x12a   : > { %v637_v40 = vpop.permute.xlu0 %636  ;;  %v671_v41 = vsel %vm670_vm13, %v667_v22, %v669_v38  ;;  %v672_v42 = vsel %vm670_vm13, %v669_v38, %v667_v22  ;;  %v604_v60 = vpop.permute.xlu2 %603 }
 0x12b   : > { %v680_v45 = vmul.f32 %v1993_v36, %v671_v41  ;;  %v681_v47 = vmul.f32 %v1995_v37, %v672_v42  ;;  %v639_v57 = vsel %vm638_vm14, %v635_v6, %v637_v40  ;;  %v640_v59 = vsel %vm638_vm14, %v637_v40, %v635_v6 }
 0x12c   : > { %v648_v63 = vmul.f32 %v644_v52, %v640_v59  ;;  %v649_v0 = vmul.f32 %v645_v54, %v639_v57  ;;  %vm919_vm14 = vcmp.lt.s32.totalorder %v1963_v58, 125 }
 0x12d   : > { %v735_v50 = vpack.c.bf16 %v680_v45, %v1899_v25  ;;  %v736_v51 = vpack.c.bf16 %v681_v47, %v1901_v26 }
 0x12f   : > { %762 = vmatpush.bf16.msra.mxu2 %v735_v50  ;;  %775 = vmatpush.bf16.msra.mxu3 %v736_v51  ;;  %v730_v50 = vld [vmem:[%s2540_s2] sm:$0xf] }
 0x131   : > { %v651_v61 = vpop.permute.xlu1 %650 }
 0x132   : > { %v619_v62 = vpop.permute.xlu0 %618  ;;  %v655_v25 = vsel %vm654_vm15, %v651_v61, %v653_v34  ;;  %v656_v26 = vsel %vm654_vm15, %v653_v34, %v651_v61  ;;  %v792_v8 = vpop.permute.xlu2 %791 }
 0x133   : > { %v664_v1 = vmul.f32 %v2013_v55, %v656_v26  ;;  %v665_v2 = vmul.f32 %v2015_v56, %v655_v25 }
 0x135   : > { %v733_v3 = vpack.c.bf16 %v664_v1, %v648_v63  ;;  %v734_v4 = vpack.c.bf16 %v665_v2, %v649_v0 }
 0x137   : > { %763 = vmatpush.bf16.msra.mxu2 %v733_v3  ;;  %776 = vmatpush.bf16.msra.mxu3 %v734_v4 }
 0x139   : > { %v602_v5 = vpop.permute.xlu1 %601 }
 0x13a   : > { %v794_v6 = vpop.permute.xlu0 %793  ;;  %v608_v24 = vsel %vm607_vm0, %v602_v5, %v604_v60  ;;  %v609_v27 = vsel %vm607_vm0, %v604_v60, %v602_v5  ;;  %v786_v41 = vpop.permute.xlu2 %785 }
 0x13b   : > { %v795_v10 = vsel %vm670_vm13, %v792_v8, %v794_v6  ;;  %v796_v11 = vsel %vm670_vm13, %v794_v6, %v792_v8  ;;  %v616_v29 = vmul.f32 %v612_v12, %v609_v27  ;;  %v617_v30 = vmul.f32 %v613_v19, %v608_v24  ;;  %v453_v24 = vld [vmem:[%s2549_s11 + $0x58] sm:$0xff] }
 0x13c   : > { %v797_v22 = vmul.f32 %v795_v10, %v1993_v36  ;;  %v798_v23 = vmul.f32 %v796_v11, %v1995_v37  ;;  %1235 = vperm.xlu2 %1752, %v453_v24  }
 0x13e   : > { %v802_v38 = vpack.c.bf16 %v797_v22, %v797_v22  ;;  %v803_v40 = vpack.c.bf16 %v798_v23, %v798_v23 }
 0x140   : > { %v814_v47 = vsel %vm750_vm10, %v802_v38, 0  ;;  %v817_v48 = vsel %vm750_vm10, %v803_v40, 0 }
 0x141   : > { %v621_v28 = vpop.permute.xlu1 %620 }
 0x142   : > { %v623_v31 = vsel %vm622_vm1, %v619_v62, %v621_v28  ;;  %v624_v32 = vsel %vm622_vm1, %v621_v28, %v619_v62  ;;  %v1039_v42 = vpop.permute.xlu0 %1038  ;;  %v1031_v62 = vpop.permute.xlu2 %1030 }
 0x143   : > { %v632_v33 = vmul.f32 %v2035_v20, %v624_v32  ;;  %v633_v34 = vmul.f32 %v2037_v21, %v623_v31 }
 0x145   : > { %v731_v43 = vpack.c.bf16 %v632_v33, %v616_v29  ;;  %v732_v45 = vpack.c.bf16 %v633_v34, %v617_v30 }
 0x147   : > { %764 = vmatpush.bf16.msra.mxu2 %v731_v43  ;;  %777 = vmatpush.bf16.msra.mxu3 %v732_v45 }
 0x149   : > { %v784_v51 = vpop.permute.xlu1 %783 }
 0x14a   : > { %v787_v52 = vsel %vm654_vm15, %v784_v51, %v786_v41  ;;  %v788_v54 = vsel %vm654_vm15, %v786_v41, %v784_v51  ;;  %1673 = vmatmul.msk.bf16.vlgmr.msra.gmra.mxu2 %vm746_vm2, %v730_v50  ;;  %1674 = vmatmul.msk.bf16.vlgmr.msra.gmra.mxu3 %vm746_vm2, %v730_v50  ;;  %v1033_v25 = vpop.permute.xlu0 %1032  ;;  %v1223_v10 = vpop.permute.xlu2 %1222  ;;  %v1046_v41 = vld [vmem:[%s2543_s5] sm:$0xf] }
 0x14b   : > { %825 = vmatpush.bf16.msrb.mxu2 %v814_v47  ;;  %838 = vmatpush.bf16.msrb.mxu3 %v817_v48  ;;  %v789_v57 = vmul.f32 %v788_v54, %v2013_v55  ;;  %v790_v59 = vmul.f32 %v787_v52, %v2015_v56  ;;  %v1035_v63 = vsel %vm622_vm1, %v1033_v25, %v1031_v62 }
 0x14c   : > { %v1034_v2 = vsel %vm622_vm1, %v1031_v62, %v1033_v25  ;;  %v1036_v3 = vmul.f32 %v1035_v63, %v2035_v20 }
 0x14d   : > { %v800_v60 = vpack.c.bf16 %v1937_v46, %v789_v57  ;;  %v801_v61 = vpack.c.bf16 %v1921_v35, %v790_v59  ;;  %v1037_v6 = vmul.f32 %v1034_v2, %v2037_v21 }
 0x14e   : > { %v1047_v12 = vpack.c.bf16 %v1928_v39, %v1036_v3  ;;  %v454_v3 = vld [vmem:[%s2549_s11 + $0x60] sm:$0xff] }
 0x14f   : > { %826 = vmatpush.bf16.msrb.mxu2 %v800_v60  ;;  %839 = vmatpush.bf16.msrb.mxu3 %v801_v61  ;;  %v1048_v23 = vpack.c.bf16 %v1935_v44, %v1037_v6 }
 0x151   : > { %v1041_v26 = vpop.permute.xlu1 %1040 }
 0x152   : > { %v1042_v0 = vsel %vm702_vm12, %v1039_v42, %v1041_v26  ;;  %v1043_v1 = vsel %vm702_vm12, %v1041_v26, %v1039_v42  ;;  %v1213_v44 = vpop.permute.xlu0 %1212 }
 0x153   : > { %v1044_v46 = vmul.f32 %v1042_v0, %v1979_v13  ;;  %v1045_v35 = vmul.f32 %v1043_v1, %v1981_v18 }
 0x155   : > { %v1049_v4 = vpack.c.bf16 %v1044_v46, %v1044_v46  ;;  %v1050_v5 = vpack.c.bf16 %v1045_v35, %v1045_v35  ;;  %v451_v46 = vld [vmem:[%s2549_s11 + $0x48] sm:$0xff]  ;;  %v449_v35 = vld [vmem:[%s2549_s11 + $0x38] sm:$0xff] }
 0x157   : > { %v1060_v7 = vsel %vm750_vm10, %v1049_v4, 0  ;;  %v1063_v8 = vsel %vm750_vm10, %v1050_v5, 0 }
 0x158   : > { %1071 = vmatpush.bf16.msra.mxu2 %v1060_v7  ;;  %1084 = vmatpush.bf16.msra.mxu3 %v1063_v8 }
 0x159   : > { %v1221_v11 = vpop.permute.xlu1 %1220 }
 0x15a   : > { %v1224_v19 = vsel %vm670_vm13, %v1221_v11, %v1223_v10  ;;  %v1225_v22 = vsel %vm670_vm13, %v1223_v10, %v1221_v11  ;;  %1675 = vmatmul.msk.bf16.vlgmr.msrb.gmra.mxu2 %vm809_vm3, %v799_v9  ;;  %1676 = vmatmul.msk.bf16.vlgmr.msrb.gmra.mxu3 %vm809_vm3, %v799_v9  ;;  %vm935_vm13 = vcmp.lt.s32.totalorder %v1963_v58, 83 }
 0x15b   : > { %v1226_v27 = vmul.f32 %v1224_v19, %v1993_v36  ;;  %v1227_v39 = vmul.f32 %v1225_v22, %v1995_v37 }
 0x15c   : > { %1072 = vmatpush.bf16.msra.mxu2 %v1047_v12  ;;  %1085 = vmatpush.bf16.msra.mxu3 %v1048_v23 }
 0x15d   : > { %v1231_v28 = vpack.c.bf16 %v1226_v27, %v1226_v27  ;;  %v1232_v29 = vpack.c.bf16 %v1227_v39, %v1227_v39 }
 0x15f   : > { %v1242_v30 = vsel %vm750_vm10, %v1231_v28, 0  ;;  %v1245_v31 = vsel %vm750_vm10, %v1232_v29, 0 }
 0x160   : > { %1253 = vmatpush.bf16.msrb.mxu2 %v1242_v30  ;;  %1266 = vmatpush.bf16.msrb.mxu3 %v1245_v31 }
 0x161   : > { %v1215_v32 = vpop.permute.xlu1 %1214 }
 0x162   : > { %v1216_v33 = vsel %vm654_vm15, %v1213_v44, %v1215_v32  ;;  %v1217_v36 = vsel %vm654_vm15, %v1215_v32, %v1213_v44  ;;  %vm903_vm15 = vcmp.lt.s32.totalorder %v1963_v58, 3 }
 0x163   : > { %v1218_v37 = vmul.f32 %v1217_v36, %v2013_v55  ;;  %v1219_v34 = vmul.f32 %v1216_v33, %v2015_v56  ;;  %v1228_v55 = vld [vmem:[%s2545_s7] sm:$0xf] }
 0x165   : > { %v1229_v38 = vpack.c.bf16 %v1945_v49, %v1218_v37  ;;  %v1230_v40 = vpack.c.bf16 %v1957_v53, %v1219_v34 }
 0x167   : > { %1254 = vmatpush.bf16.msrb.mxu2 %v1229_v38  ;;  %1267 = vmatpush.bf16.msrb.mxu3 %v1230_v40 }
 0x16a   : > { %1687 = vmatmul.msk.bf16.vlgmr.msra.gmra.mxu2 %vm809_vm3, %v1046_v41  ;;  %1688 = vmatmul.msk.bf16.vlgmr.msra.gmra.mxu3 %vm809_vm3, %v1046_v41 }
 0x17a   : > { %1691 = vmatmul.msk.bf16.vlgmr.msrb.gmra.mxu2 %vm809_vm3, %v1228_v55  ;;  %1692 = vmatmul.msk.bf16.vlgmr.msrb.gmra.mxu3 %vm809_vm3, %v1228_v55 }
 0x196   : > { %v1236_v57 = vpop.permute.xlu2 %1235 }
 0x1cd   : > { %v2112_v49 = vpop.f32.mrf.mxu2  ;;  %v2114_v53 = vpop.f32.mrf.mxu3 }
 0x1d5   : > { %v768_v56 = vpop.f32.mrf.mxu2  ;;  %v781_v42 = vpop.f32.mrf.mxu3 }
 0x1dd   : > { %v828_v43 = vpop.f32.mrf.mxu2  ;;  %v841_v45 = vpop.f32.mrf.mxu3 }
 0x1e5   : > { %v830_v47 = vpop.f32.mrf.mxu2  ;;  %v843_v48 = vpop.f32.mrf.mxu3 }
 0x1ed   : > { %v2116_v50 = vpop.f32.mrf.mxu2  ;;  %v2118_v51 = vpop.f32.mrf.mxu3 }
 0x1f5   : > { %v1076_v52 = vpop.f32.mrf.mxu2  ;;  %v1089_v54 = vpop.f32.mrf.mxu3 }
 0x1fd   : > { %v1256_v59 = vpop.f32.mrf.mxu2  ;;  %v1269_v60 = vpop.f32.mrf.mxu3 }
 0x1fe   : > { %v1257_v61 = vadd.f32 %v1256_v59, %v1236_v57  ;;  %v1270_v62 = vadd.f32 %v1269_v60, %v1236_v57  ;;  %v2233_v60 = vld [vmem:[%s2550_s12 + $0x16] ss:$8 sm:$0x3] }
 0x200   : > { %v1275_v25 = vmul.f32 0.2, %v1257_v61  ;;  %v1276_v26 = vmul.f32 0.2, %v1270_v62  ;;  %vm1273_vm4 = vcmp.ge.f32.partialorder %v1257_v61, 0.0  ;;  %vm1274_vm5 = vcmp.ge.f32.partialorder %v1270_v62, 0.0 }
 0x202   : > { %v1277_v63 = vsel %vm1273_vm4, %v1257_v61, %v1275_v25  ;;  %v1278_v0 = vsel %vm1274_vm5, %v1270_v62, %v1276_v26  ;;  %v2238_v61 = vld [vmem:[%s2550_s12 + $0x15] ss:$8 sm:$0x3]  ;;  %vm871_vm4 = vcmp.lt.s32.totalorder %v1963_v58, 48  ;;  %vm855_vm5 = vcmp.lt.s32.totalorder %v1963_v58, 51 }
 0x203   : > { %1279 = vrot.lane.b32.xlu2 %v1277_v63, %s1768_s20  ;;  %1287 = vrot.lane.b32.xlu0 %v1277_v63, %s1764_s16 }
 0x204   : > { %1289 = vrot.lane.b32.xlu1 %v1278_v0, %s1764_s16 }
 0x205   : > { %v1258_v1 = vpop.f32.mrf.mxu2  ;;  %v1271_v2 = vpop.f32.mrf.mxu3 }
 0x20b   : > { %1053 = vperm.xlu2 %1752, %v451_v46   ;;  %1281 = vrot.lane.b32.xlu0 %v1278_v0, %s1768_s20  ;;  %v941_v46 = vperm.slane %v2238_v61, 0 }
 0x20c   : > { %806 = vperm.xlu1 %1751, %v449_v35   ;;  %v942_v35 = vperm.slane %v2238_v61, 1  ;;  %v450_v61 = vld [vmem:[%s2549_s11 + $0x40] sm:$0xff] }
 0x213   : > { %1302 = vperm.xlu0 %1750, %v454_v3  }
 0x25d   : > { %v1280_v22 = vpop.permute.xlu2 %1279 }
 0x275   : > { %v1288_v4 = vpop.permute.xlu0 %1287 }
 0x276   : > { %v1290_v5 = vpop.permute.xlu1 %1289 }
 0x277   : > { %v1291_v6 = vsel %vm702_vm12, %v1288_v4, %v1290_v5  ;;  %v1292_v7 = vsel %vm702_vm12, %v1290_v5, %v1288_v4  ;;  %vm951_vm12 = vcmp.lt.s32.totalorder %v1963_v58, 80 }
 0x278   : > { %v1293_v8 = vmul.f32 %v1291_v6, %v1979_v13  ;;  %v1294_v9 = vmul.f32 %v1292_v7, %v1981_v18 }
 0x27a   : > { %v1298_v10 = vpack.c.bf16 %v1293_v8, %v1293_v8  ;;  %v1299_v11 = vpack.c.bf16 %v1294_v9, %v1294_v9 }
 0x27c   : > { %v1309_v12 = vsel %vm750_vm10, %v1298_v10, 0  ;;  %v1312_v19 = vsel %vm750_vm10, %v1299_v11, 0 }
 0x27d   : > { %1320 = vmatpush.bf16.msra.mxu2 %v1309_v12  ;;  %1333 = vmatpush.bf16.msra.mxu3 %v1312_v19  ;;  %v1282_v23 = vpop.permute.xlu0 %1281  ;;  %v2267_v19 = vld [vmem:[%s2550_s12 + $0x14] ss:$8 sm:$0x3] }
 0x27e   : > { %v1283_v24 = vsel %vm622_vm1, %v1280_v22, %v1282_v23  ;;  %v1284_v27 = vsel %vm622_vm1, %v1282_v23, %v1280_v22  ;;  %v807_v39 = vpop.permute.xlu1 %806 }
 0x27f   : > { %v1285_v13 = vmul.f32 %v1284_v27, %v2035_v20  ;;  %v1286_v18 = vmul.f32 %v1283_v24, %v2037_v21  ;;  %v829_v28 = vadd.f32 %v828_v43, %v807_v39  ;;  %v842_v29 = vadd.f32 %v841_v45, %v807_v39  ;;  %v1295_v20 = vld [vmem:[%s2546_s8] sm:$0xf]  ;;  %v1054_v21 = vpop.permute.xlu2 %1053  ;;  %v2217_v45 = vld [vmem:[%s2550_s12 + $0x17] ss:$8 sm:$0x3] }
 0x280   : > { %v1088_v37 = vadd.f32 %v2118_v51, %v1054_v21  ;;  %v1075_v34 = vadd.f32 %v2116_v50, %v1054_v21  ;;  %v973_v47 = vperm.slane %v2217_v45, 0  ;;  %v974_v48 = vperm.slane %v2217_v45, 1 }
 0x281   : > { %vm845_vm6 = vcmp.ge.f32.partialorder %v829_v28, 0.0  ;;  %vm846_vm7 = vcmp.ge.f32.partialorder %v842_v29, 0.0  ;;  %v847_v30 = vmul.f32 0.2, %v829_v28  ;;  %v848_v31 = vmul.f32 0.2, %v842_v29 }
 0x282   : > { %v1296_v44 = vpack.c.bf16 %v1277_v63, %v1285_v13  ;;  %v1297_v32 = vpack.c.bf16 %v1278_v0, %v1286_v18  ;;  %v1094_v38 = vmul.f32 0.2, %v1088_v37  ;;  %vm1092_vm8 = vcmp.ge.f32.partialorder %v1088_v37, 0.0 }
 0x283   : > { %v2147_v33 = vsel %vm845_vm6, %v829_v28, %v847_v30  ;;  %v2149_v36 = vsel %vm846_vm7, %v842_v29, %v848_v31  ;;  %v1093_v40 = vmul.f32 0.2, %v1075_v34  ;;  %vm1091_vm9 = vcmp.ge.f32.partialorder %v1075_v34, 0.0  ;;  %v2279_v30 = vld [vmem:[%s2550_s12 + $0x13] ss:$8 sm:$0x3] }
 0x284   : > { %1321 = vmatpush.bf16.msra.mxu2 %v1296_v44  ;;  %1334 = vmatpush.bf16.msra.mxu3 %v1297_v32  ;;  %v2178_v41 = vsel %vm1092_vm8, %v1088_v37, %v1094_v38  ;;  %v957_v63 = vperm.slane %v2233_v60, 0  ;;  %v958_v0 = vperm.slane %v2233_v60, 1  ;;  %v925_v24 = vperm.slane %v2267_v19, 0 }
 0x285   : > { %965 = vrot.lane.b32.xlu2 %v2149_v36, %s1770_s17  ;;  %931 = vrot.lane.b32.xlu0 %v2147_v33, %s1771_s18  ;;  %v2180_v55 = vsel %vm1091_vm9, %v1075_v34, %v1093_v40  ;;  %v1303_v42 = vpop.permute.xlu0 %1302  ;;  %v926_v27 = vperm.slane %v2267_v19, 1  ;;  %v2289_v34 = vld [vmem:[%s2550_s12 + $0x12] ss:$8 sm:$0x3]  ;;  %vm1460_vm6 = vcmp.lt.s32.totalorder %v1963_v58, 43  ;;  %vm1429_vm7 = vcmp.lt.s32.totalorder %v1963_v58, 53 }
 0x286   : > { %963 = vrot.lane.b32.xlu1 %v2147_v33, %s1770_s17  ;;  %vm1397_vm8 = vcmp.lt.s32.totalorder %v1963_v58, 5  ;;  %vm1381_vm9 = vcmp.lt.s32.totalorder %v1963_v58, 75 }
 0x287   : > { %1693 = vmatmul.msk.bf16.vlgmr.msra.gmra.mxu2 %vm809_vm3, %v1295_v20  ;;  %1694 = vmatmul.msk.bf16.vlgmr.msra.gmra.mxu3 %vm809_vm3, %v1295_v20  ;;  %vm887_vm3 = vcmp.lt.s32.totalorder %v1963_v58, 45 }
 0x28d   : > { %947 = vrot.lane.b32.xlu2 %v2147_v33, %s1772_s19  ;;  %949 = vrot.lane.b32.xlu0 %v2149_v36, %s1772_s19 }
 0x28e   : > { %933 = vrot.lane.b32.xlu1 %v2149_v36, %s1771_s18 }
 0x295   : > { %917 = vrot.lane.b32.xlu2 %v2149_v36, %s1773_s21  ;;  %883 = vrot.lane.b32.xlu0 %v2147_v33, %s1774_s22 }
 0x296   : > { %915 = vrot.lane.b32.xlu1 %v2147_v33, %s1773_s21 }
 0x29d   : > { %899 = vrot.lane.b32.xlu2 %v2147_v33, %s1775_s23  ;;  %901 = vrot.lane.b32.xlu0 %v2149_v36, %s1775_s23 }
 0x29e   : > { %885 = vrot.lane.b32.xlu1 %v2149_v36, %s1774_s22 }
 0x2a5   : > { %1155 = vrot.lane.b32.xlu2 %v2178_v41, %s1770_s17  ;;  %851 = vrot.lane.b32.xlu0 %v2147_v33, %s1776_s24 }
 0x2a6   : > { %1153 = vrot.lane.b32.xlu1 %v2180_v55, %s1770_s17 }
 0x2ad   : > { %867 = vrot.lane.b32.xlu2 %v2147_v33, %s1777_s27  ;;  %869 = vrot.lane.b32.xlu0 %v2149_v36, %s1777_s27 }
 0x2ae   : > { %853 = vrot.lane.b32.xlu1 %v2149_v36, %s1776_s24 }
 0x2b5   : > { %1139 = vrot.lane.b32.xlu2 %v2178_v41, %s1771_s18  ;;  %1145 = vrot.lane.b32.xlu0 %v2180_v55, %s1772_s19 }
 0x2b6   : > { %1137 = vrot.lane.b32.xlu1 %v2180_v55, %s1771_s18  ;;  %s1781_s18 = smov 5  }
 0x2bd   : > { %1129 = vrot.lane.b32.xlu2 %v2180_v55, %s1773_s21  ;;  %1131 = vrot.lane.b32.xlu0 %v2178_v41, %s1773_s21 }
 0x2be   : > { %1147 = vrot.lane.b32.xlu1 %v2178_v41, %s1772_s19 }
 0x2c5   : > { %1115 = vrot.lane.b32.xlu2 %v2178_v41, %s1774_s22  ;;  %1121 = vrot.lane.b32.xlu0 %v2180_v55, %s1775_s23 }
 0x2c6   : > { %1113 = vrot.lane.b32.xlu1 %v2180_v55, %s1774_s22  ;;  %s1782_s22 = smov 75  }
 0x2cd   : > { %1099 = vrot.lane.b32.xlu2 %v2178_v41, %s1776_s24  ;;  %1105 = vrot.lane.b32.xlu0 %v2180_v55, %s1777_s27 }
 0x2ce   : > { %1123 = vrot.lane.b32.xlu1 %v2178_v41, %s1775_s23  ;;  %s1783_s23 = smov 85  }
 0x2d6   : > { %1097 = vrot.lane.b32.xlu1 %v2180_v55, %s1776_s24 }
 0x2de   : > { %1107 = vrot.lane.b32.xlu1 %v2178_v41, %s1777_s27 }
 0x2df   : > { %v966_v56 = vpop.permute.xlu2 %965 }
 0x2e7   : > { %v948_v43 = vpop.permute.xlu2 %947 }
 0x2ef   : > { %v918_v26 = vpop.permute.xlu2 %917 }
 0x2f7   : > { %v932_v50 = vpop.permute.xlu0 %931  ;;  %v900_v39 = vpop.permute.xlu2 %899 }
 0x2f8   : > { %v964_v51 = vpop.permute.xlu1 %963 }
 0x2f9   : > { %v968_v52 = vsel %vm967_vm11, %v964_v51, %v966_v56  ;;  %v969_v54 = vsel %vm967_vm11, %v966_v56, %v964_v51  ;;  %v909_v56 = vperm.slane %v2279_v30, 0 }
 0x2fa   : > { %v977_v57 = vmul.f32 %v973_v47, %v968_v52  ;;  %v978_v59 = vmul.f32 %v974_v48, %v969_v54  ;;  %v894_v52 = vperm.slane %v2289_v34, 1 }
 0x2fc   : > { %v988_v62 = vpack.c.bf16 %v977_v57, %v977_v57  ;;  %v989_v25 = vpack.c.bf16 %v978_v59, %v978_v59 }
 0x2fe   : > { %v999_v1 = vsel %vm750_vm10, %v988_v62, 0  ;;  %v1002_v2 = vsel %vm750_vm10, %v989_v25, 0 }
 0x2ff   : > { %1007 = vmatpush.bf16.msrb.mxu0 %v999_v1  ;;  %1020 = vmatpush.bf16.msrb.mxu1 %v1002_v2  ;;  %v950_v3 = vpop.permute.xlu0 %949  ;;  %v1156_v25 = vpop.permute.xlu2 %1155 }
 0x300   : > { %v952_v4 = vsel %vm951_vm12, %v948_v43, %v950_v3  ;;  %v953_v5 = vsel %vm951_vm12, %v950_v3, %v948_v43  ;;  %v934_v6 = vpop.permute.xlu1 %933  ;;  %v910_v43 = vperm.slane %v2279_v30, 1  ;;  %v457_v30 = vld [vmem:[%s2549_s11 + $0x78] sm:$0xff] }
 0x301   : > { %v961_v7 = vmul.f32 %v957_v63, %v952_v4  ;;  %v962_v8 = vmul.f32 %v958_v0, %v953_v5  ;;  %v936_v9 = vsel %vm935_vm13, %v932_v50, %v934_v6  ;;  %v937_v10 = vsel %vm935_vm13, %v934_v6, %v932_v50 }
 0x302   : > { %v945_v11 = vmul.f32 %v941_v46, %v936_v9  ;;  %v946_v12 = vmul.f32 %v942_v35, %v937_v10 }
 0x304   : > { %v986_v22 = vpack.c.bf16 %v961_v7, %v945_v11  ;;  %v987_v23 = vpack.c.bf16 %v962_v8, %v946_v12  ;;  %v2328_v12 = vld [vmem:[%s2550_s12 + $0x11] ss:$8 sm:$0x3] }
 0x306   : > { %1008 = vmatpush.bf16.msrb.mxu0 %v986_v22  ;;  %1021 = vmatpush.bf16.msrb.mxu1 %v987_v23 }
 0x307   : > { %v884_v13 = vpop.permute.xlu0 %883 }
 0x308   : > { %v916_v18 = vpop.permute.xlu1 %915 }
 0x309   : > { %v920_v28 = vsel %vm919_vm14, %v916_v18, %v918_v26  ;;  %v921_v29 = vsel %vm919_vm14, %v918_v26, %v916_v18  ;;  %v877_v18 = vperm.slane %v2328_v12, 0 }
 0x30a   : > { %v929_v31 = vmul.f32 %v925_v24, %v920_v28  ;;  %v930_v44 = vmul.f32 %v926_v27, %v921_v29  ;;  %v1323_v32 = vpop.f32.mrf.mxu2  ;;  %v1336_v20 = vpop.f32.mrf.mxu3  ;;  %v878_v28 = vperm.slane %v2328_v12, 1 }
 0x30b   : > { %v1324_v21 = vadd.f32 %v1323_v32, %v1303_v42  ;;  %v1337_v37 = vadd.f32 %v1336_v20, %v1303_v42  ;;  %v893_v42 = vperm.slane %v2289_v34, 0 }
 0x30c   : > { %v984_v38 = vpack.c.bf16 %v929_v31, %v2147_v33  ;;  %v985_v40 = vpack.c.bf16 %v930_v44, %v2149_v36 }
 0x30d   : > { %vm1340_vm0 = vcmp.ge.f32.partialorder %v1324_v21, 0.0  ;;  %v1342_v50 = vmul.f32 0.2, %v1324_v21  ;;  %vm1341_vm1 = vcmp.ge.f32.partialorder %v1337_v37, 0.0  ;;  %v1343_v51 = vmul.f32 0.2, %v1337_v37 }
 0x30e   : > { %1009 = vmatpush.bf16.msrb.mxu0 %v984_v38  ;;  %1022 = vmatpush.bf16.msrb.mxu1 %v985_v40 }
 0x30f   : > { %v2298_v54 = vsel %vm1340_vm0, %v1324_v21, %v1342_v50  ;;  %v2300_v33 = vsel %vm1341_vm1, %v1337_v37, %v1343_v51  ;;  %v902_v36 = vpop.permute.xlu0 %901 }
 0x310   : > { %v904_v57 = vsel %vm903_vm15, %v900_v39, %v902_v36  ;;  %v905_v59 = vsel %vm903_vm15, %v902_v36, %v900_v39  ;;  %v886_v62 = vpop.permute.xlu1 %885  ;;  %1456 = vrot.lane.b32.xlu2 %v2298_v54, %s1778_s28  ;;  %1458 = vrot.lane.b32.xlu0 %v2300_v33, %s1778_s28  ;;  %v2337_v39 = vld [vmem:[%s2550_s12 + $0x10] ss:$8 sm:$0x3] }
 0x311   : > { %v913_v26 = vmul.f32 %v909_v56, %v905_v59  ;;  %v914_v1 = vmul.f32 %v910_v43, %v904_v57  ;;  %v888_v2 = vsel %vm887_vm3, %v884_v13, %v886_v62  ;;  %v889_v3 = vsel %vm887_vm3, %v886_v62, %v884_v13  ;;  %1441 = vrot.lane.b32.xlu1 %v2298_v54, %s1777_s27  ;;  %v868_v13 = vpop.permute.xlu2 %867 }
 0x312   : > { %v897_v4 = vmul.f32 %v893_v42, %v889_v3  ;;  %v898_v5 = vmul.f32 %v894_v52, %v888_v2  ;;  %v1338_v6 = vpop.f32.mrf.mxu3  ;;  %v1325_v7 = vpop.f32.mrf.mxu2  ;;  %v861_v44 = vperm.slane %v2337_v39, 0  ;;  %v862_v32 = vperm.slane %v2337_v39, 1  ;;  %v979_v2 = vld [vmem:[%s2542_s4] sm:$0xf] }
 0x314   : > { %v982_v8 = vpack.c.bf16 %v913_v26, %v897_v4  ;;  %v983_v9 = vpack.c.bf16 %v914_v1, %v898_v5  ;;  %v452_v5 = vld [vmem:[%s2549_s11 + $0x50] sm:$0xff] }
 0x316   : > { %1010 = vmatpush.bf16.msrb.mxu0 %v982_v8  ;;  %1023 = vmatpush.bf16.msrb.mxu1 %v983_v9 }
 0x317   : > { %v852_v10 = vpop.permute.xlu0 %851 }
 0x318   : > { %v1154_v11 = vpop.permute.xlu1 %1153  ;;  %1425 = vrot.lane.b32.xlu2 %v2298_v54, %s1779_s30  ;;  %1427 = vrot.lane.b32.xlu0 %v2300_v33, %s1779_s30 }
 0x319   : > { %1411 = vrot.lane.b32.xlu1 %v2300_v33, %s1780_s14  ;;  %v1157_v22 = vsel %vm967_vm11, %v1154_v11, %v1156_v25  ;;  %v1158_v23 = vsel %vm967_vm11, %v1156_v25, %v1154_v11  ;;  %v1140_v25 = vpop.permute.xlu2 %1139  ;;  %vm1350_vm11 = vcmp.lt.s32.totalorder %v1963_v58, 85 }
 0x31a   : > { %v1159_v29 = vmul.f32 %v1157_v22, %v973_v47  ;;  %v1160_v31 = vmul.f32 %v1158_v23, %v974_v48 }
 0x31c   : > { %v1170_v50 = vpack.c.bf16 %v1159_v29, %v1159_v29  ;;  %v1171_v51 = vpack.c.bf16 %v1160_v31, %v1160_v31 }
 0x31e   : > { %v1181_v26 = vsel %vm750_vm10, %v1170_v50, 0  ;;  %v1184_v1 = vsel %vm750_vm10, %v1171_v51, 0 }
 0x31f   : > { %v870_v20 = vpop.permute.xlu0 %869 }
 0x320   : > { %v872_v21 = vsel %vm871_vm4, %v868_v13, %v870_v20  ;;  %v873_v37 = vsel %vm871_vm4, %v870_v20, %v868_v13  ;;  %v854_v38 = vpop.permute.xlu1 %853  ;;  %1443 = vrot.lane.b32.xlu2 %v2300_v33, %s1777_s27  ;;  %1409 = vrot.lane.b32.xlu0 %v2298_v54, %s1780_s14 }
 0x321   : > { %v881_v45 = vmul.f32 %v877_v18, %v873_v37  ;;  %v882_v47 = vmul.f32 %v878_v28, %v872_v21  ;;  %v856_v48 = vsel %vm855_vm5, %v852_v10, %v854_v38  ;;  %v857_v40 = vsel %vm855_vm5, %v854_v38, %v852_v10  ;;  %1393 = vrot.lane.b32.xlu1 %v2298_v54, %s1781_s18  ;;  %v1130_v9 = vpop.permute.xlu2 %1129 }
 0x322   : > { %v865_v36 = vmul.f32 %v861_v44, %v857_v40  ;;  %v866_v57 = vmul.f32 %v862_v32, %v856_v48 }
 0x324   : > { %v980_v59 = vpack.c.bf16 %v881_v45, %v865_v36  ;;  %v981_v62 = vpack.c.bf16 %v882_v47, %v866_v57 }
 0x326   : > { %1011 = vmatpush.bf16.msrb.mxu0 %v980_v59  ;;  %1024 = vmatpush.bf16.msrb.mxu1 %v981_v62 }
 0x327   : > { %v1146_v3 = vpop.permute.xlu0 %1145 }
 0x328   : > { %v1138_v4 = vpop.permute.xlu1 %1137  ;;  %1377 = vrot.lane.b32.xlu2 %v2298_v54, %s1782_s22  ;;  %1379 = vrot.lane.b32.xlu0 %v2300_v33, %s1782_s22  ;;  %s440_s22 = scalar_lea.vmem %s2551_s13, %s1713_s29 }
 0x329   : > { %1348 = vrot.lane.b32.xlu1 %v2300_v33, %s1783_s23  ;;  %1685 = vmatmul.msk.bf16.vlgmr.msrb.gmra.mxu0 %vm746_vm2, %v979_v2  ;;  %v1141_v6 = vsel %vm935_vm13, %v1138_v4, %v1140_v25  ;;  %v1142_v7 = vsel %vm935_vm13, %v1140_v25, %v1138_v4  ;;  %v1116_v19 = vpop.permute.xlu2 %1115 }
 0x32a   : > { %1189 = vmatpush.bf16.msra.mxu0 %v1181_v26  ;;  %1202 = vmatpush.bf16.msra.mxu1 %v1184_v1  ;;  %v1143_v29 = vmul.f32 %v1141_v6, %v941_v46  ;;  %v1144_v31 = vmul.f32 %v1142_v7, %v942_v35  ;;  %v448_v35 = vld [vmem:[%s2549_s11 + $0x30] sm:$0xff]  ;;  %v442_v26 = vld [vmem:[%s2549_s11] sm:$0xff]  ;;  %v443_v1 = vld [vmem:[%s2549_s11 + $0x8] sm:$0xff] }
 0x32b   : > { %1686 = vmatmul.msk.bf16.vlgmr.msrb.gmra.mxu1 %vm746_vm2, %v979_v2 }
 0x32f   : > { %v1132_v8 = vpop.permute.xlu0 %1131 }
 0x330   : > { %v1148_v10 = vpop.permute.xlu1 %1147  ;;  %1395 = vrot.lane.b32.xlu2 %v2300_v33, %s1781_s18  ;;  %1346 = vrot.lane.b32.xlu0 %v2298_v54, %s1783_s23  ;;  %v1133_v11 = vsel %vm919_vm14, %v1130_v9, %v1132_v8  ;;  %v1134_v22 = vsel %vm919_vm14, %v1132_v8, %v1130_v9 }
 0x331   : > { %v1149_v23 = vsel %vm951_vm12, %v1146_v3, %v1148_v10  ;;  %v1150_v13 = vsel %vm951_vm12, %v1148_v10, %v1146_v3  ;;  %1174 = vperm.xlu1 %1751, %v452_v5   ;;  %v1135_v37 = vmul.f32 %v1133_v11, %v925_v24  ;;  %v1136_v38 = vmul.f32 %v1134_v22, %v926_v27  ;;  %v456_v24 = vld [vmem:[%s2549_s11 + $0x70] sm:$0xff]  ;;  %v1161_v11 = vld [vmem:[%s2544_s6] sm:$0xf] }
 0x332   : > { %v1151_v20 = vmul.f32 %v1149_v23, %v957_v63  ;;  %v1152_v21 = vmul.f32 %v1150_v13, %v958_v0  ;;  %v455_v0 = vld [vmem:[%s2549_s11 + $0x68] sm:$0xff] }
 0x333   : > { %v1166_v60 = vpack.c.bf16 %v1135_v37, %v2180_v55  ;;  %v1167_v63 = vpack.c.bf16 %v1136_v38, %v2178_v41  ;;  %v1700_v37 = vld [vmem:[%s2550_s12 + $0x25] ss:$8 sm:$0x3] }
 0x334   : > { %v1168_v45 = vpack.c.bf16 %v1151_v20, %v1143_v29  ;;  %v1169_v47 = vpack.c.bf16 %v1152_v21, %v1144_v31  ;;  %v1701_v21 = vld [vmem:[%s2550_s12 + $0x26] ss:$8 sm:$0x3] }
 0x336   : > { %1190 = vmatpush.bf16.msra.mxu0 %v1168_v45  ;;  %1203 = vmatpush.bf16.msra.mxu1 %v1169_v47  ;;  %v1450_v47 = vperm.slane %v1701_v21, 0 }
 0x337   : > { %v1122_v27 = vpop.permute.xlu0 %1121 }
 0x338   : > { %v1114_v46 = vpop.permute.xlu1 %1113  ;;  %1362 = vrot.lane.b32.xlu2 %v2298_v54, %s1772_s19  ;;  %1364 = vrot.lane.b32.xlu0 %v2300_v33, %s1772_s19 }
 0x339   : > { %992 = vperm.xlu1 %1751, %v450_v61   ;;  %v1117_v55 = vsel %vm887_vm3, %v1114_v46, %v1116_v19  ;;  %v1118_v41 = vsel %vm887_vm3, %v1116_v19, %v1114_v46  ;;  %v1451_v61 = vperm.slane %v1701_v21, 1 }
 0x33a   : > { %1191 = vmatpush.bf16.msra.mxu0 %v1166_v60  ;;  %1204 = vmatpush.bf16.msra.mxu1 %v1167_v63  ;;  %v1119_v51 = vmul.f32 %v1118_v41, %v893_v42  ;;  %v1120_v36 = vmul.f32 %v1117_v55, %v894_v52  ;;  %v1435_v63 = vperm.slane %v1700_v37, 0 }
 0x33f   : > { %v1106_v52 = vpop.permute.xlu0 %1105 }
 0x340   : > { %v1124_v48 = vpop.permute.xlu1 %1123  ;;  %1485 = vperm.xlu2 %1752, %v455_v0   ;;  %743 = vperm.xlu0 %1750, %v448_v35   ;;  %v1436_v0 = vperm.slane %v1700_v37, 1 }
 0x341   : > { %v1125_v40 = vsel %vm903_vm15, %v1122_v27, %v1124_v48  ;;  %v1126_v50 = vsel %vm903_vm15, %v1124_v48, %v1122_v27  ;;  %1531 = vperm.xlu1 %1751, %v456_v24  }
 0x342   : > { %v1127_v57 = vmul.f32 %v1126_v50, %v909_v56  ;;  %v1128_v59 = vmul.f32 %v1125_v40, %v910_v43  ;;  %v1100_v56 = vpop.permute.xlu2 %1099 }
 0x344   : > { %v1164_v62 = vpack.c.bf16 %v1127_v57, %v1119_v51  ;;  %v1165_v25 = vpack.c.bf16 %v1128_v59, %v1120_v36  ;;  %v1699_v36 = vld [vmem:[%s2550_s12 + $0x24] ss:$8 sm:$0x3] }
 0x346   : > { %1192 = vmatpush.bf16.msra.mxu0 %v1164_v62  ;;  %1205 = vmatpush.bf16.msra.mxu1 %v1165_v25  ;;  %v1419_v25 = vperm.slane %v1699_v36, 0 }
 0x348   : > { %v1098_v34 = vpop.permute.xlu1 %1097  ;;  %472 = vperm.xlu2 %1752, %v442_v26   ;;  %477 = vperm.xlu0 %1750, %v443_v1   ;;  %v1420_v26 = vperm.slane %v1699_v36, 1 }
 0x349   : > { %v1101_v43 = vsel %vm855_vm5, %v1098_v34, %v1100_v56  ;;  %v1102_v42 = vsel %vm855_vm5, %v1100_v56, %v1098_v34 }
 0x34a   : > { %v1103_v5 = vmul.f32 %v1102_v42, %v861_v44  ;;  %v1104_v6 = vmul.f32 %v1101_v43, %v862_v32  ;;  %v1698_v42 = vld [vmem:[%s2550_s12 + $0x23] ss:$8 sm:$0x3] }
 0x350   : > { %v1108_v2 = vpop.permute.xlu1 %1107  ;;  %1536 = vperm.xlu2 %1752, %v457_v30  }
 0x351   : > { %v1109_v3 = vsel %vm871_vm4, %v1106_v52, %v1108_v2  ;;  %v1110_v4 = vsel %vm871_vm4, %v1108_v2, %v1106_v52  ;;  %v1697_v52 = vld [vmem:[%s2550_s12 + $0x22] ss:$8 sm:$0x3] }
 0x352   : > { %v1111_v7 = vmul.f32 %v1110_v4, %v877_v18  ;;  %v1112_v8 = vmul.f32 %v1109_v3, %v878_v28  ;;  %v1702_v18 = vld [vmem:[%s2550_s12 + $0x27] ss:$8 sm:$0x3] }
 0x353   : > { %v1466_v12 = vperm.slane %v1702_v18, 0  ;;  %v1467_v28 = vperm.slane %v1702_v18, 1 }
 0x354   : > { %v1162_v9 = vpack.c.bf16 %v1111_v7, %v1103_v5  ;;  %v1163_v10 = vpack.c.bf16 %v1112_v8, %v1104_v6  ;;  %v1403_v5 = vperm.slane %v1698_v42, 0  ;;  %v1404_v7 = vperm.slane %v1698_v42, 1 }
 0x355   : > { %v1387_v8 = vperm.slane %v1697_v52, 0 }
 0x356   : > { %1193 = vmatpush.bf16.msra.mxu0 %v1162_v9  ;;  %1206 = vmatpush.bf16.msra.mxu1 %v1163_v10  ;;  %v1388_v9 = vperm.slane %v1697_v52, 1 }
 0x359   : > { %1689 = vmatmul.msk.bf16.vlgmr.msra.gmra.mxu0 %vm746_vm2, %v1161_v11  ;;  %1690 = vmatmul.msk.bf16.vlgmr.msra.gmra.mxu1 %vm746_vm2, %v1161_v11 }
 0x36a   : > { %v1457_v39 = vpop.permute.xlu2 %1456 }
 0x372   : > { %v1426_v44 = vpop.permute.xlu2 %1425 }
 0x37a   : > { %v1444_v29 = vpop.permute.xlu2 %1443 }
 0x382   : > { %v1459_v32 = vpop.permute.xlu0 %1458  ;;  %v1378_v57 = vpop.permute.xlu2 %1377 }
 0x383   : > { %v1461_v22 = vsel %vm1460_vm6, %v1457_v39, %v1459_v32  ;;  %v1462_v23 = vsel %vm1460_vm6, %v1459_v32, %v1457_v39  ;;  %v1442_v13 = vpop.permute.xlu1 %1441 }
 0x384   : > { %v1470_v31 = vmul.f32 %v1466_v12, %v1461_v22  ;;  %v1471_v20 = vmul.f32 %v1467_v28, %v1462_v23  ;;  %v1445_v35 = vsel %vm871_vm4, %v1442_v13, %v1444_v29  ;;  %v1446_v19 = vsel %vm871_vm4, %v1444_v29, %v1442_v13  ;;  %v1695_v13 = vld [vmem:[%s2550_s12 + $0x20] ss:$8 sm:$0x3]  ;;  %v1696_v29 = vld [vmem:[%s2550_s12 + $0x21] ss:$8 sm:$0x3] }
 0x385   : > { %v1454_v27 = vmul.f32 %v1450_v47, %v1445_v35  ;;  %v1455_v48 = vmul.f32 %v1451_v61, %v1446_v19  ;;  %v1356_v37 = vperm.slane %v1695_v13, 0  ;;  %v1372_v47 = vperm.slane %v1696_v29, 1 }
 0x386   : > { %v1481_v38 = vpack.c.bf16 %v1470_v31, %v1470_v31  ;;  %v1482_v45 = vpack.c.bf16 %v1471_v20, %v1471_v20 }
 0x388   : > { %v1492_v46 = vsel %vm750_vm10, %v1481_v38, 0  ;;  %v1495_v60 = vsel %vm750_vm10, %v1482_v45, 0  ;;  %vm1413_vm10 = vcmp.lt.s32.totalorder %v1963_v58, 123  ;;  %v1357_v38 = vperm.slane %v1695_v13, 1 }
 0x389   : > { %1500 = vmatpush.bf16.msrb.mxu0 %v1492_v46  ;;  %1513 = vmatpush.bf16.msrb.mxu1 %v1495_v60  ;;  %v1371_v45 = vperm.slane %v1696_v29, 0 }
 0x38a   : > { %v1428_v24 = vpop.permute.xlu0 %1427  ;;  %v1396_v6 = vpop.permute.xlu2 %1395 }
 0x38b   : > { %v1430_v55 = vsel %vm1429_vm7, %v1426_v44, %v1428_v24  ;;  %v1431_v41 = vsel %vm1429_vm7, %v1428_v24, %v1426_v44  ;;  %v1412_v51 = vpop.permute.xlu1 %1411 }
 0x38c   : > { %v1439_v40 = vmul.f32 %v1435_v63, %v1430_v55  ;;  %v1440_v50 = vmul.f32 %v1436_v0, %v1431_v41 }
 0x38e   : > { %v1479_v59 = vpack.c.bf16 %v1454_v27, %v1439_v40  ;;  %v1480_v62 = vpack.c.bf16 %v1455_v48, %v1440_v50 }
 0x390   : > { %1501 = vmatpush.bf16.msrb.mxu0 %v1479_v59  ;;  %1514 = vmatpush.bf16.msrb.mxu1 %v1480_v62 }
 0x392   : > { %v1410_v1 = vpop.permute.xlu0 %1409  ;;  %v1363_v60 = vpop.permute.xlu2 %1362 }
 0x393   : > { %v1414_v34 = vsel %vm1413_vm10, %v1410_v1, %v1412_v51  ;;  %v1415_v30 = vsel %vm1413_vm10, %v1412_v51, %v1410_v1  ;;  %v1394_v2 = vpop.permute.xlu1 %1393  ;;  %v1472_v51 = vld [vmem:[%s2547_s9] sm:$0xf] }
 0x394   : > { %v1423_v56 = vmul.f32 %v1419_v25, %v1414_v34  ;;  %v1424_v43 = vmul.f32 %v1420_v26, %v1415_v30  ;;  %v1398_v10 = vsel %vm1397_vm8, %v1394_v2, %v1396_v6  ;;  %v1399_v11 = vsel %vm1397_vm8, %v1396_v6, %v1394_v2 }
 0x395   : > { %v1407_v12 = vmul.f32 %v1403_v5, %v1399_v11  ;;  %v1408_v28 = vmul.f32 %v1404_v7, %v1398_v10 }
 0x396   : > { %v1477_v3 = vpack.c.bf16 %v1423_v56, %v2298_v54  ;;  %v1478_v4 = vpack.c.bf16 %v1424_v43, %v2300_v33 }
 0x398   : > { %1502 = vmatpush.bf16.msrb.mxu0 %v1477_v3  ;;  %1515 = vmatpush.bf16.msrb.mxu1 %v1478_v4 }
 0x39a   : > { %v1380_v39 = vpop.permute.xlu0 %1379  ;;  %v1486_v25 = vpop.permute.xlu2 %1485 }
 0x39b   : > { %v1382_v44 = vsel %vm1381_vm9, %v1378_v57, %v1380_v39  ;;  %v1383_v18 = vsel %vm1381_vm9, %v1380_v39, %v1378_v57  ;;  %v1349_v21 = vpop.permute.xlu1 %1348  ;;  %v1718_v39 = vld [vmem:[%s2548_s10] sm:$0xff] }
 0x39c   : > { %v1391_v32 = vmul.f32 %v1387_v8, %v1383_v18  ;;  %v1392_v54 = vmul.f32 %v1388_v9, %v1382_v44 }
 0x39e   : > { %v1475_v22 = vpack.c.bf16 %v1407_v12, %v1391_v32  ;;  %v1476_v33 = vpack.c.bf16 %v1408_v28, %v1392_v54 }
 0x3a0   : > { %1503 = vmatpush.bf16.msrb.mxu0 %v1475_v22  ;;  %1516 = vmatpush.bf16.msrb.mxu1 %v1476_v33 }
 0x3a2   : > { %v1347_v23 = vpop.permute.xlu0 %1346 }
 0x3a3   : > { %v1351_v61 = vsel %vm1350_vm11, %v1347_v23, %v1349_v21  ;;  %v1352_v46 = vsel %vm1350_vm11, %v1349_v21, %v1347_v23  ;;  %v1175_v62 = vpop.permute.xlu1 %1174 }
 0x3a4   : > { %v1360_v19 = vmul.f32 %v1356_v37, %v1352_v46  ;;  %v1361_v24 = vmul.f32 %v1357_v38, %v1351_v61 }
 0x3a6   : > { %v1013_v31 = vpop.f32.mrf.mxu0 }
 0x3a8   : > { %v1026_v20 = vpop.f32.mrf.mxu1 }
 0x3aa   : > { %v1365_v63 = vpop.permute.xlu0 %1364 }
 0x3ab   : > { %v1366_v0 = vsel %vm951_vm12, %v1363_v60, %v1365_v63  ;;  %v1367_v35 = vsel %vm951_vm12, %v1365_v63, %v1363_v60  ;;  %v993_v52 = vpop.permute.xlu1 %992 }
 0x3ac   : > { %v1375_v55 = vmul.f32 %v1371_v45, %v1367_v35  ;;  %v1376_v41 = vmul.f32 %v1372_v47, %v1366_v0  ;;  %v1014_v6 = vadd.f32 %v1013_v31, %v993_v52  ;;  %v1027_v7 = vadd.f32 %v1026_v20, %v993_v52 }
 0x3ae   : > { %v1473_v27 = vpack.c.bf16 %v1375_v55, %v1360_v19  ;;  %v1474_v48 = vpack.c.bf16 %v1376_v41, %v1361_v24  ;;  %v1015_v40 = vpop.f32.mrf.mxu0 }
 0x3b0   : > { %v1028_v50 = vpop.f32.mrf.mxu1  ;;  %1504 = vmatpush.bf16.msrb.mxu0 %v1473_v27  ;;  %1517 = vmatpush.bf16.msrb.mxu1 %v1474_v48 }
 0x3b2   : > { %v744_v26 = vpop.permute.xlu0 %743 }
 0x3b3   : > { %1703 = vmatmul.msk.bf16.vlgmr.msrb.gmra.mxu0 %vm746_vm2, %v1472_v51  ;;  %1704 = vmatmul.msk.bf16.vlgmr.msrb.gmra.mxu1 %vm746_vm2, %v1472_v51  ;;  %v767_v2 = vadd.f32 %v2112_v49, %v744_v26  ;;  %v780_v3 = vadd.f32 %v2114_v53, %v744_v26  ;;  %vm1544_vm2 = vcmask 261120   ;;  %v473_v49 = vpop.permute.xlu2 %472  ;;  %v1532_v18 = vpop.permute.xlu1 %1531 }
 0x3b4   : > { %v535_v53 = vadd.f32 %v1891_v14, %v473_v49  ;;  %v559_v44 = vadd.f32 %v1893_v15, %v473_v49 }
 0x3b5   : > { %v1523_v8 = vpack.c.bf16 %v1014_v6, %v767_v2  ;;  %v1524_v9 = vpack.c.bf16 %v1027_v7, %v780_v3 }
 0x3b6   : > { %v573_v32 = vmul.f32 0.2, %v535_v53  ;;  %v574_v54 = vmul.f32 0.2, %v559_v44 }
 0x3ba   : > { %v478_v23 = vpop.permute.xlu0 %477 }
 0x3bb   : > { %v537_v31 = vadd.f32 %v1895_v16, %v478_v23  ;;  %v561_v14 = vadd.f32 %v1897_v17, %v478_v23  ;;  %v1537_v15 = vpop.permute.xlu2 %1536 }
 0x3bd   : > { %v575_v37 = vmul.f32 0.2, %v537_v31  ;;  %v576_v38 = vmul.f32 0.2, %v561_v14 }
 0x3d6   : > { %v1195_v58 = vpop.f32.mrf.mxu0  ;;  %v1208_v36 = vpop.f32.mrf.mxu1 }
 0x3d7   : > { %v1196_v30 = vadd.f32 %v1195_v58, %v1175_v62  ;;  %v1209_v56 = vadd.f32 %v1208_v36, %v1175_v62 }
 0x3de   : > { %v1197_v57 = vpop.f32.mrf.mxu0  ;;  %v1210_v59 = vpop.f32.mrf.mxu1 }
 0x430   : > { %v1506_v1 = vpop.f32.mrf.mxu0  ;;  %v1519_v34 = vpop.f32.mrf.mxu1 }
 0x431   : > { %v1507_v43 = vadd.f32 %v1506_v1, %v1486_v25  ;;  %v1520_v42 = vadd.f32 %v1519_v34, %v1486_v25 }
 0x433   : > { %v1525_v4 = vpack.c.bf16 %v1507_v43, %v1196_v30  ;;  %v1526_v5 = vpack.c.bf16 %v1520_v42, %v1209_v56 }
 0x435   : > { %1554 = vmatpush.bf16.msrb.mxu2 %v1525_v4  ;;  %1568 = vmatpush.bf16.msrb.mxu3 %v1526_v5 }
 0x438   : > { %v1508_v10 = vpop.f32.mrf.mxu0  ;;  %v1521_v11 = vpop.f32.mrf.mxu1 }
 0x439   : > { %1555 = vmatpush.bf16.msrb.mxu2 %v1523_v8  ;;  %1569 = vmatpush.bf16.msrb.mxu3 %v1524_v9 }
 0x43c   : > { %1709 = vmatmul.msk.bf16.vlgmr.msrb.gmra.mxu2 %vm1544_vm2, %v1718_v39  ;;  %1710 = vmatmul.msk.bf16.vlgmr.msrb.gmra.mxu3 %vm1544_vm2, %v1718_v39 }
 0x4bf   : > { %v1557_v12 = vpop.f32.mrf.mxu2  ;;  %v1571_v28 = vpop.f32.mrf.mxu3 }
 0x4c0   : > { %v1558_v22 = vadd.f32 %v1557_v12, %v1532_v18  ;;  %v1572_v33 = vadd.f32 %v1571_v28, %v1532_v18 }
 0x4c2   : > { %v1576_v13 = vadd.f32 %v1558_v22, %v573_v32  ;;  %v1577_v29 = vadd.f32 %v1572_v33, %v574_v54 }
 0x4c4   : > { %1580 = vst [vmem:[%s440_s22] sm:$0xff] %v1576_v13 }
 0x4c5   : > { %1581 = vst [vmem:[%s440_s22 + $0x8] sm:$0xff] %v1577_v29 }
 0x4c7   : > { %v1559_v20 = vpop.f32.mrf.mxu2  ;;  %v1573_v21 = vpop.f32.mrf.mxu3 }
 0x4c8   : > { %v1560_v45 = vadd.f32 %v1559_v20, %v1537_v15  ;;  %v1574_v47 = vadd.f32 %v1573_v21, %v1537_v15 }
 0x4ca   : > { %v1578_v61 = vadd.f32 %v1560_v45, %v575_v37  ;;  %v1579_v46 = vadd.f32 %v1574_v47, %v576_v38 }
 0x4cc   : > { %1582 = vst [vmem:[%s440_s22 + $0x10] sm:$0xff] %v1578_v61 }
 0x4cd   : > { %1583 = vst [vmem:[%s440_s22 + $0x18] sm:$0xff] %v1579_v46 }
 0x4ce PF: > { %s23_s25 = sadd.s32 1, %s1759_s25  }
 0x4cf   : > { %p20_p4 = scmp.ge.s32.totalorder %s23_s25, 4  }
 0x4d1   :  { %22 = sbr.rel (!%p20_p4) target bundleno = 1 (0x1), region = 125 }

</bundles_post_ra>
